<compile_context>
chip_gen: v6e
topology: v6e:2x2x1
jax: 0.10.0
libtpu: 0.0.40
codegen_flags: <defaults>
</compile_context>

<pallas_src>
import functools

import jax
import jax.numpy as jnp
from jax.experimental import pallas as pl
from jax.experimental.pallas import tpu as pltpu

HIDDEN = 1024  # hidden width of both MLPs (fixed by the PyTorch module)


# --------------------------------------------------------------------------
# Feature probe: is pipeline_mode=pl.Buffered(1) supported by this Pallas?
# (Single-buffers the resident weight blocks; falls back cleanly if not.)
# --------------------------------------------------------------------------
def _probe_buffered_one():
    def _probe_kernel(x_ref, o_ref):
        o_ref[...] = x_ref[...]

    try:
        spec = pl.BlockSpec((8, 128), lambda i: (0, 0),
                            pipeline_mode=pl.Buffered(1))
        fn = pl.pallas_call(
            _probe_kernel,
            out_shape=jax.ShapeDtypeStruct((8, 128), jnp.float32),
            grid=(2,),
            in_specs=[spec],
            out_specs=pl.BlockSpec((8, 128), lambda i: (0, 0)),
        )
        jax.jit(fn).lower(jnp.zeros((8, 128), jnp.float32)).compile()
        return True
    except Exception:
        return False


_USE_BUFFERED_WEIGHTS = _probe_buffered_one()
_WEIGHT_BUFFERS = 1 if _USE_BUFFERED_WEIGHTS else 2


def _resident_spec(shape):
    """Grid-invariant whole-array block (same block for every (b, t) step)."""
    index_map = lambda b, t: (0, 0)
    if _USE_BUFFERED_WEIGHTS:
        return pl.BlockSpec(shape, index_map, pipeline_mode=pl.Buffered(1))
    return pl.BlockSpec(shape, index_map)


def _pick_time_block(T, slice_bytes, budget_bytes=4 << 20):
    """Largest divisor of T whose streamed x-block stays under budget_bytes."""
    tt = 1
    for cand in range(1, T + 1):
        if T % cand == 0 and cand * slice_bytes <= budget_bytes:
            tt = cand
    return tt


# --------------------------------------------------------------------------
# Kernel
# --------------------------------------------------------------------------
def _feature_mlp_kernel(x_ref,
                        ws1_ref, bs1_ref, ws2_ref, bs2_ref,
                        wt1_ref, bt1_ref, wt2_ref, bt2_ref,
                        sp_out_ref, tp_out_ref,
                        sacc_ref, tfeat_ref,
                        *, tt, inv_hw, inv_t):
    """Grid = (B, T // tt).  One step streams tt time slices of one batch elem.

    x_ref:       (1, tt, HW, C)  f32 input block
    ws*/wt*:     bf16 weights    (C, 1024), (1024, L2p)   [grid-invariant]
    bs*/bt*:     f32 biases      (1, 1024), (1, L2p)      [grid-invariant]
    sp_out_ref:  (1, HW, L2p)    spatial MLP output  (written at last step)
    tp_out_ref:  (1, T,  L2p)    temporal MLP output (written at last step)
    sacc_ref:    (HW, C) f32     running sum over T (spatial mean accumulator)
    tfeat_ref:   (T, C)  f32     per-t HW-pooled features (temporal means)
    """
    tb = pl.program_id(1)

    x = x_ref[0].astype(jnp.float32)                      # (tt, HW, C)

    @pl.when(tb == 0)
    def _():
        sacc_ref[...] = jnp.zeros_like(sacc_ref)

    # Spatial mean: accumulate this block's tt slices in f32 (VPU adds).
    sacc_ref[...] += jnp.sum(x, axis=0)

    # Temporal means over HW for all tt slices at once (f32 sublane reduce on
    # the XLU; no per-step bf16 cast of the full slice).
    row0 = pl.multiple_of(tb * tt, tt)
    tfeat_ref[pl.ds(row0, tt), :] = jnp.sum(x, axis=1) * inv_hw

    @pl.when(tb == pl.num_programs(1) - 1)
    def _():
        # ---- spatial MLP: Linear -> ReLU -> Linear (bf16 MXU, f32 accum) ----
        s_feat = (sacc_ref[...] * inv_t).astype(jnp.bfloat16)          # (HW, C)
        h_s = jnp.dot(s_feat, ws1_ref[...],
                      preferred_element_type=jnp.float32) + bs1_ref[...]
        h_s = jnp.maximum(h_s, 0.0).astype(jnp.bfloat16)
        sp = jnp.dot(h_s, ws2_ref[...],
                     preferred_element_type=jnp.float32) + bs2_ref[...]
        sp_out_ref[0] = sp.astype(sp_out_ref.dtype)

        # ---- temporal MLP on all T rows at once (batched M dim) ----
        t_feat = tfeat_ref[...].astype(jnp.bfloat16)                   # (T, C)
        h_t = jnp.dot(t_feat, wt1_ref[...],
                      preferred_element_type=jnp.float32) + bt1_ref[...]
        h_t = jnp.maximum(h_t, 0.0).astype(jnp.bfloat16)
        tp = jnp.dot(h_t, wt2_ref[...],
                     preferred_element_type=jnp.float32) + bt2_ref[...]
        tp_out_ref[0] = tp.astype(tp_out_ref.dtype)


# --------------------------------------------------------------------------
# Wrapper
# --------------------------------------------------------------------------
def prepare_params(params, latent_channels):
    """One-time prep (call OUTSIDE jit): pad the second-layer outputs to a
    lane-dense 128-wide slab and cast matmul weights to bf16. Biases stay f32."""
    ws1, bs1, ws2, bs2, wt1, bt1, wt2, bt2 = params
    L2 = latent_channels * 2
    L2p = max(128, ((L2 + 127) // 128) * 128)

    def pad_out(w, b):
        return (jnp.pad(w, ((0, 0), (0, L2p - L2))),
                jnp.pad(b, ((0, 0), (0, L2p - L2))))

    ws2p, bs2p = pad_out(ws2, bs2)
    wt2p, bt2p = pad_out(wt2, bt2)
    return (ws1.astype(jnp.bfloat16), bs1,
            ws2p.astype(jnp.bfloat16), bs2p,
            wt1.astype(jnp.bfloat16), bt1,
            wt2p.astype(jnp.bfloat16), bt2p)


@functools.partial(jax.jit, static_argnames=("T", "resolution", "latent_channels"))
def feature_mlp_forward(x, prepared_params, *, T, resolution, latent_channels):
    """x: (B, T*H*W, C) f32 -> (spatial (B, K, L, 2), temporal (B, T, L, 2))."""
    B, THW, C = x.shape
    HW = resolution * resolution
    assert THW == T * HW
    L2 = latent_channels * 2

    ws1b, bs1, ws2b, bs2p, wt1b, bt1, wt2b, bt2p = prepared_params
    L2p = ws2b.shape[1]

    x4 = x.reshape(B, T, HW, C)                 # channels last, glue reshape

    # Multi-T blocking: stream TT time slices per grid step (bigger DMAs).
    TT = _pick_time_block(T, HW * C * x.dtype.itemsize)
    NT = T // TT

    kernel = functools.partial(
        _feature_mlp_kernel, tt=TT, inv_hw=1.0 / HW, inv_t=1.0 / T)

    grid_spec = pltpu.PrefetchScalarGridSpec(
        num_scalar_prefetch=0,
        grid=(B, NT),
        in_specs=[
            pl.BlockSpec((1, TT, HW, C), lambda b, t: (b, t, 0, 0)),
            _resident_spec(ws1b.shape), _resident_spec(bs1.shape),
            _resident_spec(ws2b.shape), _resident_spec(bs2p.shape),
            _resident_spec(wt1b.shape), _resident_spec(bt1.shape),
            _resident_spec(wt2b.shape), _resident_spec(bt2p.shape),
        ],
        out_specs=[
            pl.BlockSpec((1, HW, L2p), lambda b, t: (b, 0, 0)),
            pl.BlockSpec((1, T, L2p), lambda b, t: (b, 0, 0)),
        ],
        scratch_shapes=[
            pltpu.VMEM((HW, C), jnp.float32),   # spatial sum accumulator
            pltpu.VMEM((T, C), jnp.float32),    # per-t temporal means
        ],
    )

    # ---- VMEM budget derived from the actual block/scratch footprint ----
    footprint = (
        2 * TT * HW * C * x.dtype.itemsize                       # x block (2 bufs)
        + (HW * C + T * C) * 4                                   # f32 scratch
        + _WEIGHT_BUFFERS * 2 * (C * HIDDEN + HIDDEN * L2p) * 2  # bf16 weights
        + _WEIGHT_BUFFERS * 2 * (HIDDEN + L2p) * 4               # f32 biases
        + 2 * (HW + T) * L2p * 4                                 # output blocks
        + (HW + T) * HIDDEN * 4                                  # MLP hidden acts
    )
    vmem_cap = 64 * 1024 * 1024                 # safe ceiling on v5e/v6e/v7x
    try:                                        # allow more on 128 MiB parts
        phys = int(getattr(pltpu.get_tpu_info(), "vmem_capacity_bytes", vmem_cap))
        vmem_cap = max(vmem_cap, phys - (32 << 20))
    except Exception:
        pass
    vmem_limit = int(min(max(32 << 20, footprint + (4 << 20)), vmem_cap))

    flops = int(2 * B * ((HW + T) * C * HIDDEN + (HW + T) * HIDDEN * L2p)
                + B * T * HW * C)
    bytes_accessed = int(
        x4.size * x4.dtype.itemsize
        + (ws1b.size + ws2b.size + wt1b.size + wt2b.size) * 2
        + (bs1.size + bs2p.size + bt1.size + bt2p.size) * 4
        + (B * HW * L2p + B * T * L2p) * 4)

    sp_pad, tp_pad = pl.pallas_call(
        kernel,
        out_shape=(
            jax.ShapeDtypeStruct((B, HW, L2p), jnp.float32),
            jax.ShapeDtypeStruct((B, T, L2p), jnp.float32),
        ),
        grid_spec=grid_spec,
        compiler_params=pltpu.CompilerParams(
            dimension_semantics=("parallel", "arbitrary"),
            vmem_limit_bytes=vmem_limit),
        cost_estimate=pl.CostEstimate(
            flops=flops, transcendentals=0, bytes_accessed=bytes_accessed),
    )(x4, ws1b, bs1, ws2b, bs2p, wt1b, bt1, wt2b, bt2p)

    # '(b k) (c c2) -> b k c c2'  and  '(b t) (c c2) -> b t c c2'
    spatial = sp_pad[:, :, :L2].reshape(B, HW, latent_channels, 2)
    temporal = tp_pad[:, :, :L2].reshape(B, T, latent_channels, 2)
    return spatial, temporal


# --------------------------------------------------------------------------
# Params / reference
# --------------------------------------------------------------------------
def init_params(key, transformer_channels, latent_channels, hidden=HIDDEN):
    """Deterministic nn.Linear-style init (uniform +/- 1/sqrt(fan_in)), f32."""
    out_features = latent_channels * 2

    def linear(k, fan_in, fan_out):
        kw, kb = jax.random.split(k)
        bound = 1.0 / jnp.sqrt(fan_in)
        w = jax.random.uniform(kw, (fan_in, fan_out), jnp.float32, -bound, bound)
        b = jax.random.uniform(kb, (1, fan_out), jnp.float32, -bound, bound)
        return w, b

    k1, k2, k3, k4 = jax.random.split(key, 4)
    ws1, bs1 = linear(k1, transformer_channels, hidden)
    ws2, bs2 = linear(k2, hidden, out_features)
    wt1, bt1 = linear(k3, transformer_channels, hidden)
    wt2, bt2 = linear(k4, hidden, out_features)
    return (ws1, bs1, ws2, bs2, wt1, bt1, wt2, bt2)


def _reference(x, params, *, T, resolution, latent_channels):
    """Pure-JAX f32 reference mirroring the PyTorch forward."""
    ws1, bs1, ws2, bs2, wt1, bt1, wt2, bt2 = params
    B, _, C = x.shape
    H = W = resolution
    x5 = x.reshape(B, T, H, W, C)
    sp = jnp.mean(x5, axis=1).reshape(B * H * W, C)
    tp = jnp.mean(x5, axis=(2, 3)).reshape(B * T, C)
    sp = jnp.maximum(sp @ ws1 + bs1, 0.0) @ ws2 + bs2
    tp = jnp.maximum(tp @ wt1 + bt1, 0.0) @ wt2 + bt2
    return (sp.reshape(B, H * W, latent_channels, 2),
            tp.reshape(B, T, latent_channels, 2))


if __name__ == "__main__":
    B = 2
    T = 2
    resolution = 4            # -> K = 16
    transformer_channels = 32
    latent_channels = 8

    key = jax.random.PRNGKey(0)
    kx, kp = jax.random.split(key)
    x = jax.random.normal(
        kx, (B, T * resolution * resolution, transformer_channels), jnp.float32)
    params = init_params(kp, transformer_channels, latent_channels)
    prepared = prepare_params(params, latent_channels)   # once, outside jit

    spatial, temporal = feature_mlp_forward(
        x, prepared, T=T, resolution=resolution, latent_channels=latent_channels)
    jax.block_until_ready((spatial, temporal))

    sp_ref, tp_ref = _reference(
        x, params, T=T, resolution=resolution, latent_channels=latent_channels)
    assert spatial.shape == (B, resolution * resolution, latent_channels, 2)
    assert temporal.shape == (B, T, latent_channels, 2)
    # bf16 MXU operands vs f32 reference -> relaxed tolerance.
    assert jnp.allclose(spatial, sp_ref, atol=5e-2, rtol=5e-2)
    assert jnp.allclose(temporal, tp_ref, atol=5e-2, rtol=5e-2)

    print("KERNEL_OK")
</pallas_src>

<mosaic_0001>
module attributes {stable_mosaic.version = 11 : i64} {
  func.func @_feature_mlp_kernel(%arg0: i32, %arg1: i32, %arg2: memref<1x2x16x32xf32, #tpu.memory_space<vmem>>, %arg3: memref<32x1024xbf16, #tpu.memory_space<vmem>>, %arg4: memref<1x1024xf32, #tpu.memory_space<vmem>>, %arg5: memref<1024x128xbf16, #tpu.memory_space<vmem>>, %arg6: memref<1x128xf32, #tpu.memory_space<vmem>>, %arg7: memref<32x1024xbf16, #tpu.memory_space<vmem>>, %arg8: memref<1x1024xf32, #tpu.memory_space<vmem>>, %arg9: memref<1024x128xbf16, #tpu.memory_space<vmem>>, %arg10: memref<1x128xf32, #tpu.memory_space<vmem>>, %arg11: memref<1x16x128xf32, #tpu.memory_space<vmem>>, %arg12: memref<1x2x128xf32, #tpu.memory_space<vmem>>, %arg13: memref<16x32xf32, #tpu.memory_space<vmem>>, %arg14: memref<2x32xf32, #tpu.memory_space<vmem>>) attributes {dimension_semantics = [#tpu.dimension_semantics<parallel>, #tpu.dimension_semantics<arbitrary>], iteration_bounds = array<i64: 2, 1>, scalar_prefetch = 0 : i64, scratch_operands = 2 : i64, tpu.core_type = #tpu.core_type<tc>, window_params = [{transform_indices = @transform_0, window_bounds = array<i64: 1, 2, 16, 32>}, {pipeline_mode = #tpu.pipeline_mode<synchronous>, transform_indices = @transform_1, window_bounds = array<i64: 32, 1024>}, {pipeline_mode = #tpu.pipeline_mode<synchronous>, transform_indices = @transform_2, window_bounds = array<i64: 1, 1024>}, {pipeline_mode = #tpu.pipeline_mode<synchronous>, transform_indices = @transform_3, window_bounds = array<i64: 1024, 128>}, {pipeline_mode = #tpu.pipeline_mode<synchronous>, transform_indices = @transform_4, window_bounds = array<i64: 1, 128>}, {pipeline_mode = #tpu.pipeline_mode<synchronous>, transform_indices = @transform_5, window_bounds = array<i64: 32, 1024>}, {pipeline_mode = #tpu.pipeline_mode<synchronous>, transform_indices = @transform_6, window_bounds = array<i64: 1, 1024>}, {pipeline_mode = #tpu.pipeline_mode<synchronous>, transform_indices = @transform_7, window_bounds = array<i64: 1024, 128>}, {pipeline_mode = #tpu.pipeline_mode<synchronous>, transform_indices = @transform_8, window_bounds = array<i64: 1, 128>}, {transform_indices = @transform_9, window_bounds = array<i64: 1, 16, 128>}, {transform_indices = @transform_10, window_bounds = array<i64: 1, 2, 128>}]} {
    %c0 = arith.constant 0 : index
    %c0_0 = arith.constant 0 : index
    %c0_1 = arith.constant 0 : index
    %c0_2 = arith.constant 0 : index
    %0 = vector.load %arg2[%c0, %c0_0, %c0_1, %c0_2] : memref<1x2x16x32xf32, #tpu.memory_space<vmem>>, vector<1x2x16x32xf32>
    %1 = vector.shape_cast %0 : vector<1x2x16x32xf32> to vector<2x16x32xf32>
    %c0_i32 = arith.constant 0 : i32
    %2 = arith.cmpi eq, %arg1, %c0_i32 : i32
    %3 = arith.extui %2 : i1 to i32
    %c0_i32_3 = arith.constant 0 : i32
    %4 = arith.cmpi ne, %3, %c0_i32_3 : i32
    scf.if %4 {
      %cst_13 = arith.constant 0.000000e+00 : f32
      %19 = vector.broadcast %cst_13 : f32 to vector<16x32xf32>
      %c0_14 = arith.constant 0 : index
      %c0_15 = arith.constant 0 : index
      %20 = vector.load %arg13[%c0_14, %c0_15] : memref<16x32xf32, #tpu.memory_space<vmem>>, vector<16x32xf32>
      tpu.vector_store %arg13[%c0_14, %c0_15], %19 {strides = array<i32>} : memref<16x32xf32, #tpu.memory_space<vmem>>, vector<16x32xf32>,
    } else {
    }
    %c0_4 = arith.constant 0 : index
    %c0_5 = arith.constant 0 : index
    %5 = vector.load %arg13[%c0_4, %c0_5] : memref<16x32xf32, #tpu.memory_space<vmem>>, vector<16x32xf32>
    %cst = arith.constant dense<0.000000e+00> : vector<16x32xf32>
    %6 = vector.multi_reduction <add>, %1, %cst [0] : vector<2x16x32xf32> to vector<16x32xf32>
    %7 = arith.addf %5, %6 : vector<16x32xf32>
    %c0_6 = arith.constant 0 : index
    %c0_7 = arith.constant 0 : index
    %8 = vector.load %arg13[%c0_6, %c0_7] : memref<16x32xf32, #tpu.memory_space<vmem>>, vector<16x32xf32>
    tpu.vector_store %arg13[%c0_6, %c0_7], %7 {strides = array<i32>} : memref<16x32xf32, #tpu.memory_space<vmem>>, vector<16x32xf32>,
    %c2_i32 = arith.constant 2 : i32
    %9 = arith.muli %arg1, %c2_i32 : i32
    %10 = tpu.assume_multiple %9, 2 : i32
    %cst_8 = arith.constant dense<0.000000e+00> : vector<2x32xf32>
    %11 = vector.multi_reduction <add>, %1, %cst_8 [1] : vector<2x16x32xf32> to vector<2x32xf32>
    %cst_9 = arith.constant 6.250000e-02 : f32
    %12 = vector.broadcast %cst_9 : f32 to vector<2x32xf32>
    %13 = arith.mulf %11, %12 : vector<2x32xf32>
    %14 = arith.index_cast %10 : i32 to index
    %c0_10 = arith.constant 0 : index
    %15 = vector.load %arg14[%14, %c0_10] : memref<2x32xf32, #tpu.memory_space<vmem>>, vector<2x32xf32>
    tpu.vector_store %arg14[%14, %c0_10], %13 {strides = array<i32>} : memref<2x32xf32, #tpu.memory_space<vmem>>, vector<2x32xf32>,
    %c0_i32_11 = arith.constant 0 : i32
    %16 = arith.cmpi eq, %arg1, %c0_i32_11 : i32
    %17 = arith.extui %16 : i1 to i32
    %c0_i32_12 = arith.constant 0 : i32
    %18 = arith.cmpi ne, %17, %c0_i32_12 : i32
    scf.if %18 {
      %c0_13 = arith.constant 0 : index
      %c0_14 = arith.constant 0 : index
      %19 = vector.load %arg13[%c0_13, %c0_14] : memref<16x32xf32, #tpu.memory_space<vmem>>, vector<16x32xf32>
      %cst_15 = arith.constant 5.000000e-01 : f32
      %20 = vector.broadcast %cst_15 : f32 to vector<16x32xf32>
      %21 = arith.mulf %19, %20 : vector<16x32xf32>
      %22 = arith.truncf %21 : vector<16x32xf32> to vector<16x32xbf16>
      %c0_16 = arith.constant 0 : index
      %c0_17 = arith.constant 0 : index
      %23 = vector.load %arg3[%c0_16, %c0_17] : memref<32x1024xbf16, #tpu.memory_space<vmem>>, vector<32x1024xbf16>
      %cst_18 = arith.constant dense<0.000000e+00> : vector<16x1024xf32>
      %24 = tpu.matmul %22, %23, %cst_18 {dimension_numbers = #tpu.dot_dimension_numbers<[1], [0], [0], [1], [0, 0, 1, 1], [], []>} : vector<16x32xbf16>, vector<32x1024xbf16>, vector<16x1024xf32> -> vector<16x1024xf32>
      %c0_19 = arith.constant 0 : index
      %c0_20 = arith.constant 0 : index
      %25 = vector.load %arg4[%c0_19, %c0_20] : memref<1x1024xf32, #tpu.memory_space<vmem>>, vector<1x1024xf32>
      %26 = vector.broadcast %25 : vector<1x1024xf32> to vector<16x1024xf32>
      %27 = arith.addf %24, %26 : vector<16x1024xf32>
      %cst_21 = arith.constant 0.000000e+00 : f32
      %28 = vector.broadcast %cst_21 : f32 to vector<16x1024xf32>
      %29 = arith.maximumf %27, %28 : vector<16x1024xf32>
      %30 = arith.truncf %29 : vector<16x1024xf32> to vector<16x1024xbf16>
      %c0_22 = arith.constant 0 : index
      %c0_23 = arith.constant 0 : index
      %31 = vector.load %arg5[%c0_22, %c0_23] : memref<1024x128xbf16, #tpu.memory_space<vmem>>, vector<1024x128xbf16>
      %cst_24 = arith.constant dense<0.000000e+00> : vector<16x128xf32>
      %32 = tpu.matmul %30, %31, %cst_24 {dimension_numbers = #tpu.dot_dimension_numbers<[1], [0], [0], [1], [0, 0, 1, 1], [], []>} : vector<16x1024xbf16>, vector<1024x128xbf16>, vector<16x128xf32> -> vector<16x128xf32>
      %c0_25 = arith.constant 0 : index
      %c0_26 = arith.constant 0 : index
      %33 = vector.load %arg6[%c0_25, %c0_26] : memref<1x128xf32, #tpu.memory_space<vmem>>, vector<1x128xf32>
      %34 = vector.broadcast %33 : vector<1x128xf32> to vector<16x128xf32>
      %35 = arith.addf %32, %34 : vector<16x128xf32>
      %c0_27 = arith.constant 0 : index
      %c0_28 = arith.constant 0 : index
      %c0_29 = arith.constant 0 : index
      %36 = vector.load %arg11[%c0_27, %c0_28, %c0_29] : memref<1x16x128xf32, #tpu.memory_space<vmem>>, vector<1x16x128xf32>
      %37 = vector.shape_cast %36 : vector<1x16x128xf32> to vector<16x128xf32>
      %38 = vector.shape_cast %35 : vector<16x128xf32> to vector<1x16x128xf32>
      tpu.vector_store %arg11[%c0_27, %c0_28, %c0_29], %38 {strides = array<i32>} : memref<1x16x128xf32, #tpu.memory_space<vmem>>, vector<1x16x128xf32>,
      %c0_30 = arith.constant 0 : index
      %c0_31 = arith.constant 0 : index
      %39 = vector.load %arg14[%c0_30, %c0_31] : memref<2x32xf32, #tpu.memory_space<vmem>>, vector<2x32xf32>
      %40 = arith.truncf %39 : vector<2x32xf32> to vector<2x32xbf16>
      %c0_32 = arith.constant 0 : index
      %c0_33 = arith.constant 0 : index
      %41 = vector.load %arg7[%c0_32, %c0_33] : memref<32x1024xbf16, #tpu.memory_space<vmem>>, vector<32x1024xbf16>
      %cst_34 = arith.constant dense<0.000000e+00> : vector<2x1024xf32>
      %42 = tpu.matmul %40, %41, %cst_34 {dimension_numbers = #tpu.dot_dimension_numbers<[1], [0], [0], [1], [0, 0, 1, 1], [], []>} : vector<2x32xbf16>, vector<32x1024xbf16>, vector<2x1024xf32> -> vector<2x1024xf32>
      %c0_35 = arith.constant 0 : index
      %c0_36 = arith.constant 0 : index
      %43 = vector.load %arg8[%c0_35, %c0_36] : memref<1x1024xf32, #tpu.memory_space<vmem>>, vector<1x1024xf32>
      %44 = vector.broadcast %43 : vector<1x1024xf32> to vector<2x1024xf32>
      %45 = arith.addf %42, %44 : vector<2x1024xf32>
      %cst_37 = arith.constant 0.000000e+00 : f32
      %46 = vector.broadcast %cst_37 : f32 to vector<2x1024xf32>
      %47 = arith.maximumf %45, %46 : vector<2x1024xf32>
      %48 = arith.truncf %47 : vector<2x1024xf32> to vector<2x1024xbf16>
      %c0_38 = arith.constant 0 : index
      %c0_39 = arith.constant 0 : index
      %49 = vector.load %arg9[%c0_38, %c0_39] : memref<1024x128xbf16, #tpu.memory_space<vmem>>, vector<1024x128xbf16>
      %cst_40 = arith.constant dense<0.000000e+00> : vector<2x128xf32>
      %50 = tpu.matmul %48, %49, %cst_40 {dimension_numbers = #tpu.dot_dimension_numbers<[1], [0], [0], [1], [0, 0, 1, 1], [], []>} : vector<2x1024xbf16>, vector<1024x128xbf16>, vector<2x128xf32> -> vector<2x128xf32>
      %c0_41 = arith.constant 0 : index
      %c0_42 = arith.constant 0 : index
      %51 = vector.load %arg10[%c0_41, %c0_42] : memref<1x128xf32, #tpu.memory_space<vmem>>, vector<1x128xf32>
      %52 = vector.broadcast %51 : vector<1x128xf32> to vector<2x128xf32>
      %53 = arith.addf %50, %52 : vector<2x128xf32>
      %c0_43 = arith.constant 0 : index
      %c0_44 = arith.constant 0 : index
      %c0_45 = arith.constant 0 : index
      %54 = vector.load %arg12[%c0_43, %c0_44, %c0_45] : memref<1x2x128xf32, #tpu.memory_space<vmem>>, vector<1x2x128xf32>
      %55 = vector.shape_cast %54 : vector<1x2x128xf32> to vector<2x128xf32>
      %56 = vector.shape_cast %53 : vector<2x128xf32> to vector<1x2x128xf32>
      tpu.vector_store %arg12[%c0_43, %c0_44, %c0_45], %56 {strides = array<i32>} : memref<1x2x128xf32, #tpu.memory_space<vmem>>, vector<1x2x128xf32>,
    } else {
    }
    return
  }
  func.func @transform_0(%arg0: i32, %arg1: i32) -> (i32, i32, i32, i32) {
    %c0_i32 = arith.constant 0 : i32
    %c0_i32_0 = arith.constant 0 : i32
    %c0_i32_1 = arith.constant 0 : i32
    return %arg0, %arg1, %c0_i32, %c0_i32_0 : i32, i32, i32, i32
  }
  func.func @transform_1(%arg0: i32, %arg1: i32) -> (i32, i32) {
    %c0_i32 = arith.constant 0 : i32
    %c0_i32_0 = arith.constant 0 : i32
    %c0_i32_1 = arith.constant 0 : i32
    return %c0_i32, %c0_i32_0 : i32, i32
  }
  func.func @transform_2(%arg0: i32, %arg1: i32) -> (i32, i32) {
    %c0_i32 = arith.constant 0 : i32
    %c0_i32_0 = arith.constant 0 : i32
    %c0_i32_1 = arith.constant 0 : i32
    return %c0_i32, %c0_i32_0 : i32, i32
  }
  func.func @transform_3(%arg0: i32, %arg1: i32) -> (i32, i32) {
    %c0_i32 = arith.constant 0 : i32
    %c0_i32_0 = arith.constant 0 : i32
    %c0_i32_1 = arith.constant 0 : i32
    return %c0_i32, %c0_i32_0 : i32, i32
  }
  func.func @transform_4(%arg0: i32, %arg1: i32) -> (i32, i32) {
    %c0_i32 = arith.constant 0 : i32
    %c0_i32_0 = arith.constant 0 : i32
    %c0_i32_1 = arith.constant 0 : i32
    return %c0_i32, %c0_i32_0 : i32, i32
  }
  func.func @transform_5(%arg0: i32, %arg1: i32) -> (i32, i32) {
    %c0_i32 = arith.constant 0 : i32
    %c0_i32_0 = arith.constant 0 : i32
    %c0_i32_1 = arith.constant 0 : i32
    return %c0_i32, %c0_i32_0 : i32, i32
  }
  func.func @transform_6(%arg0: i32, %arg1: i32) -> (i32, i32) {
    %c0_i32 = arith.constant 0 : i32
    %c0_i32_0 = arith.constant 0 : i32
    %c0_i32_1 = arith.constant 0 : i32
    return %c0_i32, %c0_i32_0 : i32, i32
  }
  func.func @transform_7(%arg0: i32, %arg1: i32) -> (i32, i32) {
    %c0_i32 = arith.constant 0 : i32
    %c0_i32_0 = arith.constant 0 : i32
    %c0_i32_1 = arith.constant 0 : i32
    return %c0_i32, %c0_i32_0 : i32, i32
  }
  func.func @transform_8(%arg0: i32, %arg1: i32) -> (i32, i32) {
    %c0_i32 = arith.constant 0 : i32
    %c0_i32_0 = arith.constant 0 : i32
    %c0_i32_1 = arith.constant 0 : i32
    return %c0_i32, %c0_i32_0 : i32, i32
  }
  func.func @transform_9(%arg0: i32, %arg1: i32) -> (i32, i32, i32) {
    %c0_i32 = arith.constant 0 : i32
    %c0_i32_0 = arith.constant 0 : i32
    %c0_i32_1 = arith.constant 0 : i32
    return %arg0, %c0_i32, %c0_i32_0 : i32, i32, i32
  }
  func.func @transform_10(%arg0: i32, %arg1: i32) -> (i32, i32, i32) {
    %c0_i32 = arith.constant 0 : i32
    %c0_i32_0 = arith.constant 0 : i32
    %c0_i32_1 = arith.constant 0 : i32
    return %arg0, %c0_i32, %c0_i32_0 : i32, i32, i32
  }
}

</mosaic_0001>

<bundles_post_ra>
// kernel: feature_mlp_forward.1
= control target key start
LH: loop header
LB: loop body
LE: loop exit
PB: predicated region body
PF: predicated region fallthrough
CT: control target
= control target key end

     0   :  { %s3942_s0 = inlined_call_operand.hbm [shape: f32[2,2,16,32], index: 0, kind: input, shape index: {}]   ;;  %s3943_s1 = inlined_call_operand.hbm [shape: bf16[32,1024], index: 1, kind: input, shape index: {}]   ;;  %s3944_s2 = inlined_call_operand.hbm [shape: f32[1,1024], index: 2, kind: input, shape index: {}]   ;;  %s3945_s3 = inlined_call_operand.hbm [shape: bf16[1024,128], index: 3, kind: input, shape index: {}]   ;;  %s3946_s4 = inlined_call_operand.vmem [shape: f32[1,128], index: 4, kind: input, shape index: {}]   ;;  %s3947_s5 = inlined_call_operand.hbm [shape: bf16[32,1024], index: 5, kind: input, shape index: {}]   ;;  %s3948_s6 = inlined_call_operand.vmem [shape: f32[1,1024], index: 6, kind: input, shape index: {}]   ;;  %s3949_s7 = inlined_call_operand.hbm [shape: bf16[1024,128], index: 7, kind: input, shape index: {}]   ;;  %s3950_s8 = inlined_call_operand.vmem [shape: f32[1,128], index: 8, kind: input, shape index: {}]   ;;  %s3951_s9 = inlined_call_operand.vmem [shape: f32[2,16,128], index: 9, kind: output, shape index: {0}]   ;;  %s3952_s10 = inlined_call_operand.vmem [shape: f32[2,2,128], index: 10, kind: output, shape index: {1}]  }
   0x1   :  { %3959 = sst [smem:[#allocation18_spill]] %s3943_s1 }
   0x2   :  { %3960 = sst [smem:[#allocation19_spill]] %s3944_s2 }
   0x3   :  { %3961 = sst [smem:[#allocation20_spill]] %s3945_s3 }
   0x4   :  { %3962 = sst [smem:[#allocation21_spill]] %s3947_s5 }
   0x5   :  { %16 = vsyncpa [#allocation5], 0 }
   0x6   :  { %18 = vsyncpa [#allocation5 + $0x1], 0 }
   0x7   :  { %19 = vsyncpa [#allocation7], 0 }
   0x8   :  { %20 = vsyncpa [#allocation10], 0 }
   0x9   :  { %21 = vsyncpa [#allocation13], 0  ;;  %s3627_s13 = smov 0   ;;  %s3629_s14 = smov 0  }
   0xa   :  { %s3631_s15 = smov 0   ;;  %s3633_s16 = smov 0  }
   0xb   :  { %s3635_s17 = smov 0   ;;  %s3637_s18 = smov 0  }
   0xc LB: > { %s2722_s19 = sadd.s32 4294967295, %s3556_s18   ;;  %p2724_p0 = scmp.ge.s32.totalorder %s3556_s18, 1  ;;  %s3556_s18 = sphi %s3637_s18, %s27_s18   ;;  %s3552_s17 = sphi %s3635_s17, %s3984_s17   ;;  %s3548_s16 = sphi %s3633_s16, %s3983_s16   ;;  %s3544_s15 = sphi %s3631_s15, %s3982_s15   ;;  %s3540_s14 = sphi %s3629_s14, %s3981_s14   ;;  %s3536_s13 = sphi %s3627_s13, %s3980_s13  }
   0xd   : > { %p3659_p1 = scmp.eq.s32.totalorder %s2722_s19, 0  ;;  %p292_p2 = scmp.lt.s32.totalorder %s3556_s18, 3 }
   0xe   : > { %s3558_s22 = smov [#allocation6]   ;;  %s3559_s25 = smov [#allocation9]  }
   0xf   : > { %s3963_s20 = scalar_select %p3659_p1, 1, 0 }
  0x10   : > { %p3664_p3 = pnand %p2724_p0, %p292_p2  ;;  %s304_s23 = sshll.u32 %s3558_s22, 4  ;;  %s305_s23 = int_to_ptr.vmem [resolvable:$true] %s304_s23 }
  0x11   : > { %s328_s26 = sshll.u32 %s3559_s25, 4  ;;  %s3347_s28 = scalar_lea.vmem %s305_s23, 2048  ;;  %s329_s26 = int_to_ptr.vmem [resolvable:$true] %s328_s26 }
  0x12   : > { %s3964_s21 = scalar_select %p3664_p3, 1, 0 }
  0x13   : > { %p3116_p4 = pneg %p3664_p3  ;;  %p3348_p7 = scmp.ne.s32.totalorder %s305_s23, %s3347_s28 }
  0x14   : > { %p3355_p10 = scmp.lt.s32.totalorder %s305_s23, %s305_s23  ;;  %p3356_p11 = scmp.lt.s32.totalorder %s3347_s28, %s3347_s28 }
  0x15   : > { %p3672_p5 = pnand %p3116_p4, %p3659_p1 }
  0x16   : > { %p3357_p12 = por %p3356_p11, %p3355_p10 }
  0x17   : > { %p3678_p6 = pneg %p3672_p5 }
  0x19   : > { %p3350_p8 = pnand %p3348_p7, %p3678_p6 }
  0x1b   : > { %p3351_p9 = pneg %p3350_p8 }
  0x1d   : > { %p3358_p13 = pnand %p3357_p12, %p3351_p9 }
  0x1f   : > { %3361 = shalt.err (!%p3358_p13)
}
  0x20   : > { %s3953_s29 = smov 512   ;;  %s3954_s30 = smov 32  }
  0x21   : > { %s3967_s1 = sld [smem:[#allocation18_spill]]  ;;  %s3373_s19 = scalar_lea.vmem %s329_s26, 8192 }
  0x22   : > { %p3374_p0 = scmp.ne.s32.totalorder %s329_s26, %s3373_s19  ;;  %p3381_p7 = scmp.lt.s32.totalorder %s329_s26, %s329_s26 }
  0x23   : > { %p3382_p8 = scmp.lt.s32.totalorder %s3373_s19, %s3373_s19 }
  0x24   : > { %p3376_p2 = pnand %p3374_p0, %p3678_p6 }
  0x25   : > { %p3383_p9 = por %p3382_p8, %p3381_p7 }
  0x26   : > { %p3377_p4 = pneg %p3376_p2 }
  0x27   : > { %3119 = dma.hbm_to_vmem [thread:$0]  (!%p3672_p5), %s3967_s1, 2048, %s305_s23, [#allocation7], %s3953_s29, %s3953_s29, %s3954_s30  }
  0x28   : > { %p3384_p10 = pnand %p3383_p9, %p3377_p4 }
  0x2a   : > { %3387 = shalt.err (!%p3384_p10)
}
  0x2b   : > { %s3958_s22 = smov 64   ;;  %s3563_s25 = smov 4  }
  0x2c   : > { %s3968_s3 = sld [smem:[#allocation20_spill]]  ;;  %s3564_s11 = smov [#allocation8]  }
  0x2d   : > { %s318_s12 = sshll.u32 %s3564_s11, 4  ;;  %s3565_s29 = smov [#allocation11]   ;;  %s319_s12 = int_to_ptr.vmem [resolvable:$true] %s318_s12 }
  0x2e   : > { %s344_s30 = sshll.u32 %s3565_s29, 4  ;;  %s3399_s19 = scalar_lea.vmem %s319_s12, 128  ;;  %s345_s30 = int_to_ptr.vmem [resolvable:$true] %s344_s30 }
  0x2f   : > { %p3400_p11 = scmp.ne.s32.totalorder %s319_s12, %s3399_s19  ;;  %p3407_p0 = scmp.lt.s32.totalorder %s319_s12, %s319_s12 }
  0x30   : > { %p3408_p2 = scmp.lt.s32.totalorder %s3399_s19, %s3399_s19 }
  0x31   : > { %p3402_p12 = pnand %p3400_p11, %p3678_p6 }
  0x32   : > { %3125 = dma.hbm_to_vmem [thread:$0]  (!%p3672_p5), %s3968_s3, 8192, %s329_s26, [#allocation10], %s3958_s22, %s3958_s22, %s3563_s25  }
  0x33   : > { %p3403_p13 = pneg %p3402_p12  ;;  %p3409_p4 = por %p3408_p2, %p3407_p0 }
  0x35   : > { %p3410_p7 = pnand %p3409_p4, %p3403_p13 }
  0x37   : > { %3413 = shalt.err (!%p3410_p7)
}
  0x38   : > { %s3969_s2 = sld [smem:[#allocation19_spill]]  ;;  %s3425_s29 = scalar_lea.vmem %s345_s30, 2048 }
  0x39   : > { %p3426_p8 = scmp.ne.s32.totalorder %s345_s30, %s3425_s29  ;;  %p3433_p3 = scmp.lt.s32.totalorder %s345_s30, %s345_s30 }
  0x3a   : > { %p3434_p11 = scmp.lt.s32.totalorder %s3425_s29, %s3425_s29 }
  0x3b   : > { %p3428_p9 = pnand %p3426_p8, %p3678_p6 }
  0x3c   : > { %p3435_p12 = por %p3434_p11, %p3433_p3 }
  0x3d   : > { %p3429_p10 = pneg %p3428_p9 }
  0x3e   : > { %3122 = dma.hbm_to_vmem [thread:$0]  (!%p3672_p5), %s3969_s2, 128, %s319_s12, [#allocation7]  }
  0x3f   : > { %p3436_p1 = pnand %p3435_p12, %p3429_p10 }
  0x41   : > { %3439 = shalt.err (!%p3436_p1)
}
  0x42   : > { %s3970_s23 = smov 32   ;;  %s3971_s11 = smov 512  }
  0x43   : > { %s3972_s5 = sld [smem:[#allocation21_spill]]  ;;  %s3566_s12 = smov [#allocation12]  }
  0x44   : > { %s360_s28 = sshll.u32 %s3566_s12, 4  ;;  %s361_s28 = int_to_ptr.vmem [resolvable:$true] %s360_s28 }
  0x45   : > { %s3451_s26 = scalar_lea.vmem %s361_s28, 8192  ;;  %p3459_p2 = scmp.lt.s32.totalorder %s361_s28, %s361_s28 }
  0x46   : > { %p3452_p13 = scmp.ne.s32.totalorder %s361_s28, %s3451_s26  ;;  %p3460_p1 = scmp.lt.s32.totalorder %s3451_s26, %s3451_s26 }
  0x48   : > { %p3454_p0 = pnand %p3452_p13, %p3678_p6  ;;  %p3461_p4 = por %p3460_p1, %p3459_p2 }
  0x49   : > { %3128 = dma.hbm_to_vmem [thread:$0]  (!%p3672_p5), %s3972_s5, 2048, %s345_s30, [#allocation10], %s3971_s11, %s3971_s11, %s3970_s23  }
  0x4a   : > { %p3455_p3 = pneg %p3454_p0 }
  0x4c   : > { %p3462_p7 = pnand %p3461_p4, %p3455_p3 }
  0x4e   : > { %3465 = shalt.err (!%p3462_p7)
}
  0x4f   : > { %s3973_s29 = smov 64   ;;  %s39_s24 = sadd.s32 1, %s3552_s17 }
  0x50   : > { %3131 = dma.hbm_to_vmem [thread:$0]  (!%p3672_p5), %s3949_s7, 8192, %s361_s28, [#allocation13], %s3973_s29, %s3973_s29, %s3563_s25  }
  0x51   : > { %p41_p6 = scmp.ge.s32.totalorder %s39_s24, 2  ;;  %s48_s27 = sadd.s32 1, %s3544_s15 }
  0x52   : > { %p55_p8 = scmp.ne.s32.totalorder %s3544_s15, %s3540_s14  ;;  %p56_p9 = scmp.eq.s32.totalorder %s3556_s18, 0 }
  0x53   : > { %s3986_s24 = smov (%p41_p6, %s39_s24), 0  ;;  %p61_p11 = scmp.ne.s32.totalorder %s3540_s14, %s3536_s13 }
  0x54   : > { %p3736_p10 = por %p56_p9, %p55_p8  ;;  %s43_s11 = ssub.s32 %s3552_s17, %s3986_s24 }
  0x55   : > { %p3141_p12 = scmp.lt.s32.totalorder %s3556_s18, 2  ;;  %p46_p13 = scmp.eq.s32.totalorder %s43_s11, 0 }
  0x56   : > { %p3975_p0 = scmp.ne.s32.totalorder %s3963_s20, 0  ;;  %s377_s19 = sand.u32 1, %s3544_s15  }
  0x57   : > { %s2916_s12 = sshll.u32 %s3552_s17, 9  ;;  %s2731_s26 = sshll.u32 %s377_s19, 5 }
  0x58   : > { %p3747_p3 = por %p3975_p0, %p61_p11  ;;  %s390_s30 = scalar_lea.hbm %s3942_s0, %s2916_s12 }
  0x59   : > { %s3754_s28 = scalar_select %p46_p13, %s3544_s15, %s48_s27  }
  0x5a   : > { %s381_s1 = scalar_lea.vmem [#allocation4], %s2731_s26  ;;  %p3761_p5 = pnand %p3141_p12, %p3736_p10 }
  0x5b   : > { %s391_s2 = sshll.u32 %s381_s1, 4  ;;  %s378_s11 = scalar_lea.sflag [#allocation5], %s377_s19  ;;  %s392_s2 = int_to_ptr.vmem [resolvable:$true] %s391_s2 }
  0x5c   : > { %p3468_p2 = pneg %p3761_p5  ;;  %s3479_s3 = scalar_lea.vmem %s392_s2, 512 }
  0x5d   : > { %p3480_p1 = scmp.ne.s32.totalorder %s392_s2, %s3479_s3  ;;  %s3567_s27 = smov [#allocation4]  }
  0x5e   : > { %s3484_s5 = sshll.u32 %s3567_s27, 4  ;;  %s3485_s5 = int_to_ptr.vmem [resolvable:$false] %s3484_s5 }
  0x5f   : > { %p3482_p4 = pnand %p3480_p1, %p3468_p2  ;;  %s3486_s12 = scalar_lea.vmem %s3485_s5, 1024 }
  0x60   : > { %p3487_p6 = scmp.lt.s32.totalorder %s392_s2, %s3485_s5  ;;  %p3488_p8 = scmp.lt.s32.totalorder %s3486_s12, %s3479_s3 }
  0x61   : > { %p3483_p7 = pneg %p3482_p4 }
  0x62   : > { %p3489_p9 = por %p3488_p8, %p3487_p6 }
  0x64   : > { %p3490_p10 = pnand %p3489_p9, %p3483_p7 }
  0x66   : > { %3493 = shalt.err (!%p3490_p10)
}
  0x67   : > { %s3568_s1 = smov 128   ;;  %s3569_s23 = smov 8  }
  0x68   : > { %3135 = dma.hbm_to_vmem [thread:$0]  (!%p3761_p5), %s390_s30, 512, %s392_s2, %s378_s11, %s3568_s1, %s3568_s1, %s3569_s23  }
  0x69   : > { %p3978_p11 = scmp.ne.s32.totalorder %s3964_s21, 0 }
  0x6a   : > { %s405_s19 = sand.u32 (!%p3978_p11), 1, %s3540_s14  }
  0x6b   : > { %403 = sbr.rel (%p3978_p11) target bundleno = 825 (0x339), region = 56  ;;  %s2735_s26 = sshll.u32 (!%p3978_p11), %s405_s19, 5 }
  0x6c   : > { %s406_s29 = scalar_lea.sflag (!%p3978_p11), [#allocation5], %s405_s19  ;;  %s3772_s22 = scalar_lea.vmem (!%p3978_p11), [#allocation4], %s2735_s26 }
  0x70   : > { %3519 = dma.done.wait (%p3747_p3), %s406_s29, 512  }
  0x71   : > { %3521 = vsyncadd (%p3747_p3), %s406_s29, 4294966784  ;;  %p3979_p12 = scmp.ne.s32.totalorder %s3963_s20, 0 }
  0x73   : > { %3523 = dma.done.wait (%p3979_p12), [#allocation7], 2176  }
  0x74   : > { %3525 = vsyncadd (%p3979_p12), [#allocation7], 4294965120 }
  0x75   : > { %3527 = dma.done.wait (%p3979_p12), [#allocation10], 10240  }
  0x76   : > { %3529 = vsyncadd (%p3979_p12), [#allocation10], 4294957056 }
  0x77   : > { %3531 = dma.done.wait (%p3979_p12), [#allocation13], 8192  }
  0x78   : > { %3533 = vsyncadd (%p3979_p12), [#allocation13], 4294959104  ;;  %vm489_vm0 = vcmask 261120   ;;  %v3570_v0 = vmov 0   ;;  %v3571_v1 = vmov 0.0   ;;  %v546_v2 = vld [vmem:[#allocation6 + $0x40] sm:$0xff] }
  0x79   : > { %711 = vmatprep.mubr.bf16.mxu0 %v3570_v0  ;;  %754 = vmatprep.mubr.bf16.mxu1 %v3570_v0  ;;  %490 = vst.msk [vmem:[#allocation2] sm:$0xff] %vm489_vm0, %v3571_v1  ;;  %491 = vst.msk [vmem:[#allocation2 + $0x8] sm:$0xff] %vm489_vm0, %v3571_v1  ;;  %v550_v3 = vld [vmem:[#allocation6 + $0x60] sm:$0xff]  ;;  %v547_v4 = vld [vmem:[#allocation6 + $0x48] sm:$0xff]  ;;  %vm524_vm1 = vcmask 1041409   ;;  %vm528_vm2 = vcmask 254976  }
  0x7a   : > { %v2753_v5 = vcombine.high %v546_v2, %v550_v3  ;;  %v551_v6 = vld [vmem:[#allocation6 + $0x68] sm:$0xff]  ;;  %v2752_v7 = vcombine.low %v546_v2, %v550_v3  ;;  %v538_v8 = vld [vmem:[#allocation6] sm:$0xff]  ;;  %v483_v19 = vld [vmem:[%s3772_s22 + $0x10] sm:$0xff]  ;;  %p471_p13 = scmp.lt.s32.totalorder %s3548_s16, 1 }
  0x7b   : > { %v542_v9 = vld [vmem:[#allocation6 + $0x20] sm:$0xff]  ;;  %v2755_v10 = vcombine.high %v547_v4, %v551_v6  ;;  %v2754_v11 = vcombine.low %v547_v4, %v551_v6  ;;  %v539_v13 = vld [vmem:[#allocation6 + $0x8] sm:$0xff]  ;;  %v484_v20 = vld [vmem:[%s3772_s22 + $0x18] sm:$0xff]  ;;  %v496_v25 = vsel %vm489_vm0, %v483_v19, 0.0 }
  0x7c   : > { %v2745_v12 = vcombine.high %v538_v8, %v542_v9  ;;  %v543_v14 = vld [vmem:[#allocation6 + $0x28] sm:$0xff]  ;;  %v481_v15 = vld [vmem:[%s3772_s22] sm:$0xff]  ;;  %691 = vmatprep.subr.bf16.mxu0 %v2753_v5  ;;  %v2744_v17 = vcombine.low %v538_v8, %v542_v9  ;;  %v499_v27 = vsel %vm489_vm0, %v484_v20, 0.0  ;;  %v548_v28 = vld [vmem:[#allocation6 + $0x50] sm:$0xff]  ;;  %s3988_s16 = smov (!%p471_p13, %s3548_s16), 1 }
  0x7d   : > { %v2747_v16 = vcombine.high %v539_v13, %v543_v14  ;;  %v482_v18 = vld [vmem:[%s3772_s22 + $0x8] sm:$0xff]  ;;  %v495_v21 = vsel %vm489_vm0, %v481_v15, 0.0  ;;  %734 = vmatprep.subr.bf16.mxu1 %v2755_v10  ;;  %692 = vmatpush1.bf16.msra.mxu0 %v2752_v7  ;;  %v2746_v22 = vcombine.low %v539_v13, %v543_v14  ;;  %v552_v32 = vld [vmem:[#allocation6 + $0x70] sm:$0xff]  ;;  %v549_v33 = vld [vmem:[#allocation6 + $0x58] sm:$0xff]  ;;  %v3804_v35 = vadd.f32 %v499_v27, %v496_v25  ;;  %s2917_s21 = sshll.u32 %s3988_s16, 4  ;;  %s2743_s12 = sshll.u32 %s3988_s16, 1 }
  0x7e   : > { %v498_v26 = vsel %vm489_vm0, %v482_v18, 0.0  ;;  %735 = vmatpush1.bf16.msra.mxu1 %v2754_v11  ;;  %693 = vmatprep.subr.bf16.mxu0 %v2745_v12  ;;  %v497_v29 = vadd.f32 %v496_v25, %v495_v21  ;;  %v553_v34 = vld [vmem:[#allocation6 + $0x78] sm:$0xff]  ;;  %v2757_v36 = vcombine.high %v548_v28, %v552_v32  ;;  %v540_v40 = vld [vmem:[#allocation6 + $0x10] sm:$0xff]  ;;  %v2756_v48 = vcombine.low %v548_v28, %v552_v32  ;;  %v3208_v55 = vld [vmem:[#allocation9 + $0x78] sm:$0xff]   ;;  %s475_s13 = scalar_lea.vmem %s3951_s9, %s2917_s21  ;;  %s479_s19 = scalar_lea.vmem %s3952_s10, %s2743_s12 }
  0x7f   : > { %v500_v30 = vadd.f32 %v499_v27, %v498_v26  ;;  %v3802_v31 = vadd.f32 %v498_v26, %v495_v21  ;;  %736 = vmatprep.subr.bf16.mxu1 %v2747_v16  ;;  %v2759_v39 = vcombine.high %v549_v33, %v553_v34  ;;  %v544_v41 = vld [vmem:[#allocation6 + $0x30] sm:$0xff]  ;;  %v541_v42 = vld [vmem:[#allocation6 + $0x18] sm:$0xff]  ;;  %v2758_v49 = vcombine.low %v549_v33, %v553_v34  ;;  %v3209_v56 = vld [vmem:[#allocation9 + $0xf8] sm:$0xff]  }
  0x80   : > { %v492_v23 = vld [vmem:[#allocation2] sm:$0xff]  ;;  %v493_v24 = vld [vmem:[#allocation2 + $0x8] sm:$0xff]  ;;  %v2749_v51 = vcombine.high %v540_v40, %v544_v41  ;;  %v2748_v53 = vcombine.low %v540_v40, %v544_v41  ;;  %v3210_v57 = vld [vmem:[#allocation9 + $0x38] sm:$0xff]   ;;  %v514_v27 = vrot.slane %v3804_v35, 4 }
  0x81   : > { %v501_v37 = vadd.f32 %v497_v29, %v492_v23  ;;  %v502_v38 = vadd.f32 %v500_v30, %v493_v24  ;;  %694 = vmatpush1.bf16.msra.mxu0 %v2744_v17  ;;  %v545_v45 = vld [vmem:[#allocation6 + $0x38] sm:$0xff]  ;;  %v3211_v58 = vld [vmem:[#allocation9 + $0xb8] sm:$0xff]   ;;  %v3216_v63 = vld [vmem:[#allocation9 + $0x68] sm:$0xff]   ;;  %v507_v26 = vrot.slane %v3802_v31, 4 }
  0x82   : > { %737 = vmatpush1.bf16.msra.mxu1 %v2746_v22  ;;  %777 = vmatprep.subr.bf16.mxu0 %v2757_v36  ;;  %v2751_v52 = vcombine.high %v541_v42, %v545_v45  ;;  %v2750_v54 = vcombine.low %v541_v42, %v545_v45  ;;  %v3212_v59 = vld [vmem:[#allocation9 + $0x70] sm:$0xff]   ;;  %v3217_v1 = vld [vmem:[#allocation9 + $0xe8] sm:$0xff]   ;;  %v3220_v4 = vld [vmem:[#allocation9 + $0x60] sm:$0xff]   ;;  %v515_v29 = vadd.f32 %v514_v27, %v3804_v35 }
  0x83   : > { %503 = vst.msk [vmem:[#allocation2] sm:$0xff] %vm489_vm0, %v501_v37  ;;  %504 = vst.msk [vmem:[#allocation2 + $0x8] sm:$0xff] %vm489_vm0, %v502_v38  ;;  %820 = vmatprep.subr.bf16.mxu1 %v2759_v39  ;;  %v3213_v60 = vld [vmem:[#allocation9 + $0xf0] sm:$0xff]   ;;  %v3218_v2 = vld [vmem:[#allocation9 + $0x28] sm:$0xff]   ;;  %v508_v28 = vadd.f32 %v507_v26, %v3802_v31 }
  0x84   : > { %v3214_v61 = vld [vmem:[#allocation9 + $0x30] sm:$0xff]   ;;  %v3219_v3 = vld [vmem:[#allocation9 + $0xa8] sm:$0xff]   ;;  %v3221_v5 = vld [vmem:[#allocation9 + $0xe0] sm:$0xff]   ;;  %v516_v32 = vrot.slane %v515_v29, 2 }
  0x85   : > { %v3215_v62 = vld [vmem:[#allocation9 + $0xb0] sm:$0xff]   ;;  %v3222_v6 = vld [vmem:[#allocation9 + $0x20] sm:$0xff]   ;;  %v3224_v8 = vld [vmem:[#allocation9 + $0x58] sm:$0xff]   ;;  %v509_v30 = vrot.slane %v508_v28, 2 }
  0x86   : > { %v3223_v7 = vld [vmem:[#allocation9 + $0xa0] sm:$0xff]   ;;  %v3225_v9 = vld [vmem:[#allocation9 + $0xd8] sm:$0xff]   ;;  %v3228_v12 = vld [vmem:[#allocation9 + $0x50] sm:$0xff]   ;;  %v517_v34 = vadd.f32 %v516_v32, %v515_v29 }
  0x87   : > { %v3226_v10 = vld [vmem:[#allocation9 + $0x18] sm:$0xff]   ;;  %v3229_v13 = vld [vmem:[#allocation9 + $0xd0] sm:$0xff]   ;;  %v3232_v16 = vld [vmem:[#allocation9 + $0x48] sm:$0xff]   ;;  %v510_v33 = vadd.f32 %v509_v30, %v508_v28 }
  0x88   : > { %v3227_v11 = vld [vmem:[#allocation9 + $0x98] sm:$0xff]   ;;  %v3230_v14 = vld [vmem:[#allocation9 + $0x10] sm:$0xff]   ;;  %v3233_v17 = vld [vmem:[#allocation9 + $0xc8] sm:$0xff]   ;;  %v518_v37 = vrot.slane %v517_v34, 1 }
  0x89   : > { %v3231_v15 = vld [vmem:[#allocation9 + $0x90] sm:$0xff]   ;;  %v3234_v18 = vld [vmem:[#allocation9 + $0x8] sm:$0xff]   ;;  %v3236_v20 = vld [vmem:[#allocation9 + $0x40] sm:$0xff]   ;;  %v511_v36 = vrot.slane %v510_v33, 1 }
  0x8a   : > { %v533_v43 = vld [vmem:[#allocation2] sm:$0xff]  ;;  %v534_v44 = vld [vmem:[#allocation2 + $0x8] sm:$0xff]  ;;  %v3240_v24 = vld [vmem:[#allocation9 + $0x178] sm:$0xff]   ;;  %v519_v39 = vadd.f32 %v518_v37, %v517_v34 }
  0x8b   : > { %v535_v46 = vmul.f32 0.5, %v533_v43  ;;  %v536_v47 = vmul.f32 0.5, %v534_v44  ;;  %v3235_v19 = vld [vmem:[#allocation9 + $0x88] sm:$0xff]   ;;  %v3237_v21 = vld [vmem:[#allocation9 + $0xc0] sm:$0xff]   ;;  %v3241_v25 = vld [vmem:[#allocation9 + $0x1f8] sm:$0xff]   ;;  %v512_v38 = vadd.f32 %v511_v36, %v510_v33  ;;  %v556_v43 = vlaneseq }
  0x8c   : > { %v3238_v22 = vld [vmem:[#allocation9] sm:$0xff]   ;;  %v521_v41 = vmul.f32 0.0625, %v519_v39  ;;  %v3244_v29 = vld [vmem:[#allocation9 + $0x170] sm:$0xff]  }
  0x8d   : > { %v537_v50 = vpack.c.bf16 %v536_v47, %v535_v46  ;;  %v3239_v23 = vld [vmem:[#allocation9 + $0x80] sm:$0xff]   ;;  %v520_v40 = vmul.f32 0.0625, %v512_v38  ;;  %v3818_v44 = vshrl.u32 %v556_v43, 7  ;;  %v3824_v47 = vld [vmem:[#allocation8] sm:$0xff]  ;;  %v3245_v30 = vld [vmem:[#allocation9 + $0x1f0] sm:$0xff]  }
  0x8e   : > { %v3246_v37 = vld [vmem:[#allocation9 + $0x130] sm:$0xff]   ;;  %v3248_v43 = vld [vmem:[#allocation9 + $0x168] sm:$0xff]  }
  0x8f   : > { %2760 = vmatmul.mubr.msk.bf16.vlgmr.msra.gmra.mxu0 %vm489_vm0, %v537_v50  ;;  %2761 = vmatmul.mubr.msk.bf16.vlgmr.msra.gmra.mxu1 %vm489_vm0, %v537_v50  ;;  %v525_v42 = vsel %vm524_vm1, %v521_v41, %v520_v40  ;;  %v562_v31 = vsub.s32 1, %v3818_v44  ;;  %v570_v35 = vsub.s32 3, %v3818_v44  ;;  %v558_v45 = vsub.s32 0, %v3818_v44  ;;  %v3247_v38 = vld [vmem:[#allocation9 + $0x1b0] sm:$0xff]  }
  0x90   : > { %778 = vmatpush1.bf16.msra.mxu0 %v2756_v48  ;;  %821 = vmatpush1.bf16.msra.mxu1 %v2758_v49  ;;  %529 = vst.msk [vmem:[#allocation3] sm:$0x3] %vm528_vm2, %v525_v42  ;;  %v566_v46 = vsub.s32 2, %v3818_v44 }
  0x91   : > { %779 = vmatprep.subr.bf16.mxu0 %v2749_v51  ;;  %822 = vmatprep.subr.bf16.mxu1 %v2751_v52  ;;  %v571_v51 = vrot.slane %v3824_v47, %v570_v35  ;;  %v559_v52 = vrot.slane %v3824_v47, %v558_v45 }
  0x92   : > { %797 = vmatprep.mubr.bf16.mxu0 %v3570_v0  ;;  %840 = vmatprep.mubr.bf16.mxu1 %v3570_v0 }
  0x94   : > { %780 = vmatpush1.bf16.msra.mxu0 %v2748_v53  ;;  %823 = vmatpush1.bf16.msra.mxu1 %v2750_v54  ;;  %v567_v53 = vrot.slane %v3824_v47, %v566_v46 }
  0x95   : > { %2918 = vmatprep.subr.bf16.mxu0 %v3208_v55  ;;  %2940 = vmatprep.subr.bf16.mxu1 %v3209_v56  ;;  %v578_v56 = vsub.s32 5, %v3818_v44 }
  0x97   : > { %2762 = vmatmul.mubr.msk.bf16.vlgmr.msra.gmra.mxu0 %vm489_vm0, %v537_v50  ;;  %2763 = vmatmul.mubr.msk.bf16.vlgmr.msra.gmra.mxu1 %vm489_vm0, %v537_v50  ;;  %v563_v50 = vrot.slane %v3824_v47, %v562_v31 }
  0x98   : > { %2919 = vmatpush3.bf16.msra.mxu0 %v3210_v57  ;;  %2941 = vmatpush3.bf16.msra.mxu1 %v3211_v58  ;;  %v586_v57 = vsub.s32 7, %v3818_v44 }
  0x99   : > { %2920 = vmatprep.subr.bf16.mxu0 %v3212_v59  ;;  %2942 = vmatprep.subr.bf16.mxu1 %v3213_v60 }
  0x9c   : > { %2921 = vmatpush3.bf16.msra.mxu0 %v3214_v61  ;;  %2943 = vmatpush3.bf16.msra.mxu1 %v3215_v62 }
  0x9d   : > { %2922 = vmatprep.subr.bf16.mxu0 %v3216_v63  ;;  %2944 = vmatprep.subr.bf16.mxu1 %v3217_v1 }
  0xa0   : > { %2923 = vmatpush3.bf16.msra.mxu0 %v3218_v2  ;;  %2945 = vmatpush3.bf16.msra.mxu1 %v3219_v3 }
  0xa1   : > { %2924 = vmatprep.subr.bf16.mxu0 %v3220_v4  ;;  %2946 = vmatprep.subr.bf16.mxu1 %v3221_v5 }
  0xa4   : > { %2925 = vmatpush3.bf16.msra.mxu0 %v3222_v6  ;;  %2947 = vmatpush3.bf16.msra.mxu1 %v3223_v7  ;;  %v579_v7 = vrot.slane %v3824_v47, %v578_v56 }
  0xa5   : > { %2926 = vmatprep.subr.bf16.mxu0 %v3224_v8  ;;  %2948 = vmatprep.subr.bf16.mxu1 %v3225_v9  ;;  %v587_v8 = vrot.slane %v3824_v47, %v586_v57 }
  0xa8   : > { %2927 = vmatpush3.bf16.msra.mxu0 %v3226_v10  ;;  %2949 = vmatpush3.bf16.msra.mxu1 %v3227_v11 }
  0xa9   : > { %2928 = vmatprep.subr.bf16.mxu0 %v3228_v12  ;;  %2950 = vmatprep.subr.bf16.mxu1 %v3229_v13 }
  0xac   : > { %2929 = vmatpush3.bf16.msra.mxu0 %v3230_v14  ;;  %2951 = vmatpush3.bf16.msra.mxu1 %v3231_v15 }
  0xad   : > { %2930 = vmatprep.subr.bf16.mxu0 %v3232_v16  ;;  %2952 = vmatprep.subr.bf16.mxu1 %v3233_v17 }
  0xb0   : > { %2931 = vmatpush3.bf16.msra.mxu0 %v3234_v18  ;;  %2953 = vmatpush3.bf16.msra.mxu1 %v3235_v19 }
  0xb1   : > { %2932 = vmatprep.subr.bf16.mxu0 %v3236_v20  ;;  %2954 = vmatprep.subr.bf16.mxu1 %v3237_v21 }
  0xb4   : > { %2933 = vmatpush3.bf16.msra.mxu0 %v3238_v22  ;;  %2955 = vmatpush3.bf16.msra.mxu1 %v3239_v23  ;;  %v3242_v23 = vld [vmem:[#allocation9 + $0x138] sm:$0xff]  }
  0xb5   : > { %2962 = vmatprep.subr.bf16.mxu0 %v3240_v24  ;;  %2984 = vmatprep.subr.bf16.mxu1 %v3241_v25  ;;  %v3243_v24 = vld [vmem:[#allocation9 + $0x1b8] sm:$0xff]  }
 0x14f   : > { %v713_v48 = vpop.f32.mrf.mxu0  ;;  %v756_v49 = vpop.f32.mrf.mxu1 }
 0x150   : > { %v714_v1 = vadd.f32 %v713_v48, %v559_v52  ;;  %v757_v2 = vadd.f32 %v756_v49, %v567_v53  ;;  %v3249_v48 = vld [vmem:[#allocation9 + $0x1e8] sm:$0xff]  }
 0x151   : > { %v715_v54 = vpop.f32.mrf.mxu0  ;;  %v758_v55 = vpop.f32.mrf.mxu1 }
 0x152   : > { %v716_v60 = vadd.f32 %v715_v54, %v563_v50  ;;  %v759_v61 = vadd.f32 %v758_v55, %v571_v51  ;;  %v851_v17 = vmax.f32 %v714_v1, 0.0  ;;  %v853_v18 = vmax.f32 %v757_v2, 0.0  ;;  %v3252_v55 = vld [vmem:[#allocation9 + $0x160] sm:$0xff]   ;;  %v3258_v1 = vld [vmem:[#allocation9 + $0x118] sm:$0xff]  }
 0x153   : > { %v717_v58 = vpop.f32.mrf.mxu0  ;;  %v760_v59 = vpop.f32.mrf.mxu1  ;;  %v3259_v2 = vld [vmem:[#allocation9 + $0x198] sm:$0xff]  }
 0x154   : > { %v718_v62 = vadd.f32 %v717_v58, %v559_v52  ;;  %v761_v63 = vadd.f32 %v760_v59, %v567_v53  ;;  %v852_v13 = vmax.f32 %v716_v60, 0.0  ;;  %v854_v14 = vmax.f32 %v759_v61, 0.0  ;;  %v3251_v52 = vld [vmem:[#allocation9 + $0x1a8] sm:$0xff]   ;;  %v3253_v58 = vld [vmem:[#allocation9 + $0x1e0] sm:$0xff]   ;;  %v3256_v61 = vld [vmem:[#allocation9 + $0x158] sm:$0xff]  }
 0x155   : > { %v719_v3 = vpop.f32.mrf.mxu0  ;;  %v762_v4 = vpop.f32.mrf.mxu1  ;;  %v3254_v59 = vld [vmem:[#allocation9 + $0x120] sm:$0xff]  }
 0x156   : > { %v720_v5 = vadd.f32 %v719_v3, %v563_v50  ;;  %v763_v6 = vadd.f32 %v762_v4, %v571_v51  ;;  %v859_v9 = vmax.f32 %v718_v62, 0.0  ;;  %v861_v10 = vmax.f32 %v761_v63, 0.0  ;;  %v3250_v51 = vld [vmem:[#allocation9 + $0x128] sm:$0xff]   ;;  %v3255_v60 = vld [vmem:[#allocation9 + $0x1a0] sm:$0xff]   ;;  %v3257_v62 = vld [vmem:[#allocation9 + $0x1d8] sm:$0xff]  }
 0x157   : > { %v3846_v11 = vpop.f32.mrf.mxu0  ;;  %v3848_v12 = vpop.f32.mrf.mxu1  ;;  %v574_v63 = vsub.s32 4, %v3818_v44  ;;  %v582_v3 = vsub.s32 6, %v3818_v44  ;;  %v3260_v4 = vld [vmem:[#allocation9 + $0x150] sm:$0xff]  }
 0x158   : > { %v860_v15 = vmax.f32 %v720_v5, 0.0  ;;  %v862_v16 = vmax.f32 %v763_v6, 0.0  ;;  %v867_v27 = vpack.c.bf16 %v859_v9, %v851_v17  ;;  %v869_v28 = vpack.c.bf16 %v861_v10, %v853_v18  ;;  %v3261_v5 = vld [vmem:[#allocation9 + $0x1d0] sm:$0xff]   ;;  %v3264_v10 = vld [vmem:[#allocation9 + $0x148] sm:$0xff]   ;;  %v3268_v17 = vld [vmem:[#allocation9 + $0x140] sm:$0xff]  }
 0x159   : > { %v801_v19 = vpop.f32.mrf.mxu0  ;;  %v844_v20 = vpop.f32.mrf.mxu1  ;;  %v575_v6 = vrot.slane %v3824_v47, %v574_v63  ;;  %v583_v9 = vrot.slane %v3824_v47, %v582_v3  ;;  %v3269_v18 = vld [vmem:[#allocation9 + $0x1c0] sm:$0xff]  }
 0x15a   : > { %v868_v21 = vpack.c.bf16 %v860_v15, %v852_v13  ;;  %v870_v22 = vpack.c.bf16 %v862_v16, %v854_v14  ;;  %v802_v25 = vadd.f32 %v801_v19, %v579_v7  ;;  %v845_v26 = vadd.f32 %v844_v20, %v587_v8  ;;  %v3265_v13 = vld [vmem:[#allocation9 + $0x1c8] sm:$0xff]   ;;  %v1570_v19 = vld [vmem:[#allocation11 + $0x40] sm:$0xff] }
 0x15b   : > { %v3850_v32 = vpop.f32.mrf.mxu0  ;;  %v3852_v33 = vpop.f32.mrf.mxu1  ;;  %v3266_v14 = vld [vmem:[#allocation9 + $0x108] sm:$0xff]   ;;  %v800_v16 = vadd.f32 %v3846_v11, %v575_v6  ;;  %v843_v20 = vadd.f32 %v3848_v12, %v583_v9  ;;  %v1574_v47 = vld [vmem:[#allocation11 + $0x60] sm:$0xff] }
 0x15c   : > { %1426 = vmatprep.mubr.bf16.mxu0 %v868_v21  ;;  %1467 = vmatprep.mubr.bf16.mxu1 %v870_v22  ;;  %v856_v39 = vmax.f32 %v802_v25, 0.0  ;;  %v858_v40 = vmax.f32 %v845_v26, 0.0  ;;  %v3267_v15 = vld [vmem:[#allocation9 + $0x188] sm:$0xff]   ;;  %v804_v21 = vadd.f32 %v3850_v32, %v575_v6  ;;  %v847_v22 = vadd.f32 %v3852_v33, %v583_v9  ;;  %v3270_v25 = vld [vmem:[#allocation9 + $0x100] sm:$0xff]   ;;  %v3273_v9 = vld [vmem:[#allocation12 + $0xf8] sm:$0xff]  }
 0x15d   : > { %1427 = vmatmul.mubr.bf16.vlgmr.msra.gmra.mxu0 %v867_v27  ;;  %1468 = vmatmul.mubr.bf16.vlgmr.msra.gmra.mxu1 %v869_v28  ;;  %v805_v34 = vpop.f32.mrf.mxu0  ;;  %v848_v36 = vpop.f32.mrf.mxu1  ;;  %v3271_v11 = vld [vmem:[#allocation9 + $0x180] sm:$0xff]   ;;  %v2838_v26 = vcombine.high %v1570_v19, %v1574_v47  ;;  %v855_v28 = vmax.f32 %v800_v16, 0.0  ;;  %v1563_v33 = vld [vmem:[#allocation11 + $0x8] sm:$0xff]  ;;  %v3278_v16 = vld [vmem:[#allocation12 + $0x30] sm:$0xff]  }
 0x15e   : > { %2963 = vmatpush3.bf16.msra.mxu0 %v3242_v23  ;;  %2985 = vmatpush3.bf16.msra.mxu1 %v3243_v24  ;;  %v806_v41 = vadd.f32 %v805_v34, %v579_v7  ;;  %v849_v42 = vadd.f32 %v848_v36, %v587_v8  ;;  %v3262_v7 = vld [vmem:[#allocation9 + $0x110] sm:$0xff]   ;;  %v1571_v23 = vld [vmem:[#allocation11 + $0x48] sm:$0xff]  ;;  %v865_v34 = vmax.f32 %v847_v22, 0.0  ;;  %v1562_v12 = vld [vmem:[#allocation11] sm:$0xff] }
 0x15f   : > { %2964 = vmatprep.subr.bf16.mxu0 %v3244_v29  ;;  %2986 = vmatprep.subr.bf16.mxu1 %v3245_v30  ;;  %v3263_v8 = vld [vmem:[#allocation9 + $0x190] sm:$0xff]   ;;  %v1575_v24 = vld [vmem:[#allocation11 + $0x68] sm:$0xff]  ;;  %v857_v29 = vmax.f32 %v843_v20, 0.0  ;;  %v863_v30 = vmax.f32 %v804_v21, 0.0  ;;  %v1566_v32 = vld [vmem:[#allocation11 + $0x20] sm:$0xff] }
 0x160   : > { %v864_v49 = vmax.f32 %v806_v41, 0.0  ;;  %v866_v50 = vmax.f32 %v849_v42, 0.0  ;;  %v2840_v27 = vcombine.high %v1571_v23, %v1575_v24  ;;  %v1567_v36 = vld [vmem:[#allocation11 + $0x28] sm:$0xff]  ;;  %v3284_v21 = vld [vmem:[#allocation12 + $0x60] sm:$0xff]  }
 0x161   : > { %v873_v41 = vpack.c.bf16 %v865_v34, %v857_v29  ;;  %v2832_v42 = vcombine.high %v1563_v33, %v1567_v36  ;;  %v3283_v20 = vld [vmem:[#allocation12 + $0xa8] sm:$0xff]   ;;  %v3285_v22 = vld [vmem:[#allocation12 + $0xe0] sm:$0xff]   ;;  %v3294_v29 = vld [vmem:[#allocation12 + $0x10] sm:$0xff]  }
 0x162   : > { %2965 = vmatpush3.bf16.msra.mxu0 %v3246_v37  ;;  %2987 = vmatpush3.bf16.msra.mxu1 %v3247_v38  ;;  %v872_v53 = vpack.c.bf16 %v864_v49, %v856_v39  ;;  %v874_v54 = vpack.c.bf16 %v866_v50, %v858_v40  ;;  %v2837_v37 = vcombine.low %v1570_v19, %v1574_v47  ;;  %v1573_v49 = vld [vmem:[#allocation11 + $0x58] sm:$0xff]  ;;  %v3282_v19 = vld [vmem:[#allocation12 + $0x28] sm:$0xff]   ;;  %v3286_v47 = vld [vmem:[#allocation12 + $0x20] sm:$0xff]  }
 0x163   : > { %2966 = vmatprep.subr.bf16.mxu0 %v3248_v43  ;;  %2988 = vmatprep.subr.bf16.mxu1 %v3249_v48  ;;  %v2839_v38 = vcombine.low %v1571_v23, %v1575_v24  ;;  %v2830_v39 = vcombine.high %v1562_v12, %v1566_v32  ;;  %v871_v40 = vpack.c.bf16 %v863_v30, %v855_v28  ;;  %v1572_v43 = vld [vmem:[#allocation11 + $0x50] sm:$0xff]  ;;  %v1577_v50 = vld [vmem:[#allocation11 + $0x78] sm:$0xff]  ;;  %v3287_v23 = vld [vmem:[#allocation12 + $0xa0] sm:$0xff]  }
 0x164   : > { %1508 = vmatprep.mubr.bf16.mxu0 %v872_v53  ;;  %1549 = vmatprep.mubr.bf16.mxu1 %v874_v54  ;;  %v1576_v48 = vld [vmem:[#allocation11 + $0x70] sm:$0xff]  ;;  %v3288_v24 = vld [vmem:[#allocation12 + $0x58] sm:$0xff]   ;;  %v3296_v34 = vld [vmem:[#allocation12 + $0x48] sm:$0xff]  }
 0x165   : > { %v1560_v53 = vld [vmem:[#allocation3] sm:$0x3]  ;;  %v2842_v54 = vcombine.high %v1572_v43, %v1576_v48 }
 0x166   : > { %2967 = vmatpush3.bf16.msra.mxu0 %v3250_v51  ;;  %2989 = vmatpush3.bf16.msra.mxu1 %v3251_v52  ;;  %v2829_v51 = vcombine.low %v1562_v12, %v1566_v32  ;;  %v2831_v52 = vcombine.low %v1563_v33, %v1567_v36  ;;  %v3293_v28 = vld [vmem:[#allocation12 + $0xd0] sm:$0xff]   ;;  %v3297_v12 = vld [vmem:[#allocation12 + $0xc8] sm:$0xff]   ;;  %v3300_v36 = vld [vmem:[#allocation12 + $0x40] sm:$0xff]  }
 0x167   : > { %2968 = vmatprep.subr.bf16.mxu0 %v3252_v55  ;;  %2990 = vmatprep.subr.bf16.mxu1 %v3253_v58  ;;  %v2844_v55 = vcombine.high %v1573_v49, %v1577_v50  ;;  %v1564_v58 = vld [vmem:[#allocation11 + $0x10] sm:$0xff]  ;;  %v3298_v32 = vld [vmem:[#allocation12 + $0x8] sm:$0xff]  }
 0x168   : > { %v3295_v30 = vld [vmem:[#allocation12 + $0x90] sm:$0xff]   ;;  %v3299_v33 = vld [vmem:[#allocation12 + $0x88] sm:$0xff]  }
 0x16a   : > { %2969 = vmatpush3.bf16.msra.mxu0 %v3254_v59  ;;  %2991 = vmatpush3.bf16.msra.mxu1 %v3255_v60  ;;  %v1568_v59 = vld [vmem:[#allocation11 + $0x30] sm:$0xff]  ;;  %v1565_v60 = vld [vmem:[#allocation11 + $0x18] sm:$0xff] }
 0x16b   : > { %2970 = vmatprep.subr.bf16.mxu0 %v3256_v61  ;;  %2992 = vmatprep.subr.bf16.mxu1 %v3257_v62  ;;  %v1569_v61 = vld [vmem:[#allocation11 + $0x38] sm:$0xff]  ;;  %v1561_v62 = vpack.c.bf16 %v1560_v53, %v1560_v53  ;;  %v2833_v6 = vcombine.low %v1564_v58, %v1568_v59  ;;  %v2764_v53 = vld [vmem:[%s3946_s4] ss:$0 sm:$0xff] }
 0x16e   : > { %2971 = vmatpush3.bf16.msra.mxu0 %v3258_v1  ;;  %2993 = vmatpush3.bf16.msra.mxu1 %v3259_v2  ;;  %v2841_v1 = vcombine.low %v1572_v43, %v1576_v48  ;;  %v2843_v2 = vcombine.low %v1573_v49, %v1577_v50 }
 0x16f   : > { %2972 = vmatprep.subr.bf16.mxu0 %v3260_v4  ;;  %2994 = vmatprep.subr.bf16.mxu1 %v3261_v5  ;;  %v2834_v4 = vcombine.high %v1564_v58, %v1568_v59  ;;  %v2836_v5 = vcombine.high %v1565_v60, %v1569_v61 }
 0x172   : > { %2973 = vmatpush3.bf16.msra.mxu0 %v3262_v7  ;;  %2995 = vmatpush3.bf16.msra.mxu1 %v3263_v8  ;;  %v2835_v7 = vcombine.low %v1565_v60, %v1569_v61  ;;  %v3272_v8 = vld [vmem:[#allocation12 + $0x78] sm:$0xff]  }
 0x173   : > { %2974 = vmatprep.subr.bf16.mxu0 %v3264_v10  ;;  %2996 = vmatprep.subr.bf16.mxu1 %v3265_v13  ;;  %v3274_v10 = vld [vmem:[#allocation12 + $0x38] sm:$0xff]  }
 0x174   : > { %v3275_v13 = vld [vmem:[#allocation12 + $0xb8] sm:$0xff]  }
 0x176   : > { %2975 = vmatpush3.bf16.msra.mxu0 %v3266_v14  ;;  %2997 = vmatpush3.bf16.msra.mxu1 %v3267_v15  ;;  %v3276_v14 = vld [vmem:[#allocation12 + $0x70] sm:$0xff]  }
 0x177   : > { %2976 = vmatprep.subr.bf16.mxu0 %v3268_v17  ;;  %2998 = vmatprep.subr.bf16.mxu1 %v3269_v18  ;;  %v3277_v15 = vld [vmem:[#allocation12 + $0xf0] sm:$0xff]   ;;  %v3281_v18 = vld [vmem:[#allocation12 + $0xe8] sm:$0xff]  }
 0x178   : > { %v3279_v17 = vld [vmem:[#allocation12 + $0xb0] sm:$0xff]  }
 0x17a   : > { %2977 = vmatpush3.bf16.msra.mxu0 %v3270_v25  ;;  %2999 = vmatpush3.bf16.msra.mxu1 %v3271_v11  ;;  %v3289_v25 = vld [vmem:[#allocation12 + $0xd8] sm:$0xff]  }
 0x17b   : > { %1715 = vmatprep.subr.bf16.mxu0 %v2838_v26  ;;  %1756 = vmatprep.subr.bf16.mxu1 %v2840_v27  ;;  %v3290_v11 = vld [vmem:[#allocation12 + $0x18] sm:$0xff]   ;;  %v3292_v27 = vld [vmem:[#allocation12 + $0x50] sm:$0xff]  }
 0x17c   : > { %v3291_v26 = vld [vmem:[#allocation12 + $0x98] sm:$0xff]  }
 0x17d   : > { %1509 = vmatmul.mubr.bf16.vlgmr.msra.gmra.mxu0 %v871_v40  ;;  %1550 = vmatmul.mubr.bf16.vlgmr.msra.gmra.mxu1 %v873_v41  ;;  %v3304_v40 = vld [vmem:[#allocation12 + $0x178] sm:$0xff]  }
 0x17e   : > { %1716 = vmatpush1.bf16.msra.mxu0 %v2837_v37  ;;  %1757 = vmatpush1.bf16.msra.mxu1 %v2839_v38  ;;  %v3301_v37 = vld [vmem:[#allocation12 + $0xc0] sm:$0xff]   ;;  %v3305_v41 = vld [vmem:[#allocation12 + $0x1f8] sm:$0xff]  }
 0x17f   : > { %1717 = vmatprep.subr.bf16.mxu0 %v2830_v39  ;;  %1758 = vmatprep.subr.bf16.mxu1 %v2832_v42  ;;  %v3302_v38 = vld [vmem:[#allocation12] sm:$0xff]  }
 0x180   : > { %1735 = vmatprep.mubr.bf16.mxu0 %v3570_v0  ;;  %1776 = vmatprep.mubr.bf16.mxu1 %v3570_v0  ;;  %v3303_v39 = vld [vmem:[#allocation12 + $0x80] sm:$0xff]  }
 0x182   : > { %1718 = vmatpush1.bf16.msra.mxu0 %v2829_v51  ;;  %1759 = vmatpush1.bf16.msra.mxu1 %v2831_v52 }
 0x183   : > { %1797 = vmatprep.subr.bf16.mxu0 %v2842_v54  ;;  %1838 = vmatprep.subr.bf16.mxu1 %v2844_v55 }
 0x185   : > { %2845 = vmatmul.mubr.msk.bf16.vlgmr.msra.gmra.mxu0 %vm489_vm0, %v1561_v62  ;;  %2846 = vmatmul.mubr.msk.bf16.vlgmr.msra.gmra.mxu1 %vm489_vm0, %v1561_v62 }
 0x186   : > { %1798 = vmatpush1.bf16.msra.mxu0 %v2841_v1  ;;  %1839 = vmatpush1.bf16.msra.mxu1 %v2843_v2  ;;  %v3884_v1 = vld [vmem:[%s3948_s6] sm:$0xff] }
 0x187   : > { %1799 = vmatprep.subr.bf16.mxu0 %v2834_v4  ;;  %1840 = vmatprep.subr.bf16.mxu1 %v2836_v5 }
 0x188   : > { %1817 = vmatprep.mubr.bf16.mxu0 %v3570_v0  ;;  %1858 = vmatprep.mubr.bf16.mxu1 %v3570_v0  ;;  %v3280_v0 = vld [vmem:[#allocation12 + $0x68] sm:$0xff]  }
 0x18a   : > { %1800 = vmatpush1.bf16.msra.mxu0 %v2833_v6  ;;  %1841 = vmatpush1.bf16.msra.mxu1 %v2835_v7 }
 0x18b   : > { %3006 = vmatprep.subr.bf16.mxu0 %v3272_v8  ;;  %3028 = vmatprep.subr.bf16.mxu1 %v3273_v9 }
 0x18d   : > { %2847 = vmatmul.mubr.msk.bf16.vlgmr.msra.gmra.mxu0 %vm489_vm0, %v1561_v62  ;;  %2848 = vmatmul.mubr.msk.bf16.vlgmr.msra.gmra.mxu1 %vm489_vm0, %v1561_v62 }
 0x18e   : > { %3007 = vmatpush3.bf16.msra.mxu0 %v3274_v10  ;;  %3029 = vmatpush3.bf16.msra.mxu1 %v3275_v13  ;;  %v1583_v10 = vrot.slane %v3884_v1, %v558_v45  ;;  %v1587_v45 = vrot.slane %v3884_v1, %v562_v31 }
 0x18f   : > { %3008 = vmatprep.subr.bf16.mxu0 %v3276_v14  ;;  %3030 = vmatprep.subr.bf16.mxu1 %v3277_v15 }
 0x192   : > { %3009 = vmatpush3.bf16.msra.mxu0 %v3278_v16  ;;  %3031 = vmatpush3.bf16.msra.mxu1 %v3279_v17  ;;  %v1591_v16 = vrot.slane %v3884_v1, %v566_v46 }
 0x193   : > { %3010 = vmatprep.subr.bf16.mxu0 %v3280_v0  ;;  %3032 = vmatprep.subr.bf16.mxu1 %v3281_v18 }
 0x196   : > { %3011 = vmatpush3.bf16.msra.mxu0 %v3282_v19  ;;  %3033 = vmatpush3.bf16.msra.mxu1 %v3283_v20 }
 0x197   : > { %3012 = vmatprep.subr.bf16.mxu0 %v3284_v21  ;;  %3034 = vmatprep.subr.bf16.mxu1 %v3285_v22 }
 0x19a   : > { %3013 = vmatpush3.bf16.msra.mxu0 %v3286_v47  ;;  %3035 = vmatpush3.bf16.msra.mxu1 %v3287_v23  ;;  %v1595_v47 = vrot.slane %v3884_v1, %v570_v35 }
 0x19b   : > { %3014 = vmatprep.subr.bf16.mxu0 %v3288_v24  ;;  %3036 = vmatprep.subr.bf16.mxu1 %v3289_v25 }
 0x19e   : > { %3015 = vmatpush3.bf16.msra.mxu0 %v3290_v11  ;;  %3037 = vmatpush3.bf16.msra.mxu1 %v3291_v26 }
 0x19f   : > { %3016 = vmatprep.subr.bf16.mxu0 %v3292_v27  ;;  %3038 = vmatprep.subr.bf16.mxu1 %v3293_v28 }
 0x1a2   : > { %3017 = vmatpush3.bf16.msra.mxu0 %v3294_v29  ;;  %3039 = vmatpush3.bf16.msra.mxu1 %v3295_v30 }
 0x1a3   : > { %3018 = vmatprep.subr.bf16.mxu0 %v3296_v34  ;;  %3040 = vmatprep.subr.bf16.mxu1 %v3297_v12 }
 0x1a6   : > { %3019 = vmatpush3.bf16.msra.mxu0 %v3298_v32  ;;  %3041 = vmatpush3.bf16.msra.mxu1 %v3299_v33 }
 0x1a7   : > { %3020 = vmatprep.subr.bf16.mxu0 %v3300_v36  ;;  %3042 = vmatprep.subr.bf16.mxu1 %v3301_v37 }
 0x1aa   : > { %3021 = vmatpush3.bf16.msra.mxu0 %v3302_v38  ;;  %3043 = vmatpush3.bf16.msra.mxu1 %v3303_v39  ;;  %v3306_v39 = vld [vmem:[#allocation12 + $0x138] sm:$0xff]  }
 0x1ab   : > { %3050 = vmatprep.subr.bf16.mxu0 %v3304_v40  ;;  %3072 = vmatprep.subr.bf16.mxu1 %v3305_v41  ;;  %v1603_v40 = vrot.slane %v3884_v1, %v578_v56  ;;  %v1611_v41 = vrot.slane %v3884_v1, %v586_v57  ;;  %v3310_v56 = vld [vmem:[#allocation12 + $0x130] sm:$0xff]  }
 0x1ac   : > { %v3311_v57 = vld [vmem:[#allocation12 + $0x1b0] sm:$0xff]  }
 0x21d   : > { %v2934_v42 = vpop.f32.mrf.mxu0  ;;  %v2956_v43 = vpop.f32.mrf.mxu1 }
 0x21f   : > { %v2935_v48 = vpop.f32.mrf.mxu0  ;;  %v2957_v49 = vpop.f32.mrf.mxu1 }
 0x220   : > { %v2936_v52 = vadd.f32 %v2935_v48, %v2934_v42  ;;  %v2958_v62 = vadd.f32 %v2957_v49, %v2956_v43  ;;  %v3307_v48 = vld [vmem:[#allocation12 + $0x1b8] sm:$0xff]   ;;  %v3308_v49 = vld [vmem:[#allocation12 + $0x170] sm:$0xff]  }
 0x221   : > { %v2937_v50 = vpop.f32.mrf.mxu0  ;;  %v2959_v51 = vpop.f32.mrf.mxu1 }
 0x222   : > { %v1429_v58 = vadd.f32 %v2936_v52, %v2764_v53  ;;  %v3309_v52 = vld [vmem:[#allocation12 + $0x1f0] sm:$0xff]  }
 0x223   : > { %v2938_v54 = vpop.f32.mrf.mxu0  ;;  %v2960_v55 = vpop.f32.mrf.mxu1 }
 0x224   : > { %v2939_v59 = vadd.f32 %v2938_v54, %v2937_v50  ;;  %v1470_v5 = vadd.f32 %v2958_v62, %v1429_v58  ;;  %v2961_v13 = vadd.f32 %v2960_v55, %v2959_v51  ;;  %v3313_v62 = vld [vmem:[#allocation12 + $0x1e8] sm:$0xff]  }
 0x226   : > { %v1432_v6 = vadd.f32 %v2939_v59, %v2764_v53  ;;  %v3312_v59 = vld [vmem:[#allocation12 + $0x168] sm:$0xff]  }
 0x228   : > { %v1473_v18 = vadd.f32 %v2961_v13, %v1432_v6  ;;  %v3316_v13 = vld [vmem:[#allocation12 + $0x160] sm:$0xff]  }
 0x23d   : > { %v2978_v60 = vpop.f32.mrf.mxu0  ;;  %v3000_v61 = vpop.f32.mrf.mxu1 }
 0x23f   : > { %v2979_v2 = vpop.f32.mrf.mxu0  ;;  %v3001_v4 = vpop.f32.mrf.mxu1 }
 0x240   : > { %v2980_v7 = vadd.f32 %v2979_v2, %v2978_v60  ;;  %v3002_v15 = vadd.f32 %v3001_v4, %v3000_v61 }
 0x241   : > { %v2981_v8 = vpop.f32.mrf.mxu0  ;;  %v3003_v9 = vpop.f32.mrf.mxu1 }
 0x242   : > { %v1511_v14 = vadd.f32 %v2980_v7, %v1470_v5  ;;  %v3314_v7 = vld [vmem:[#allocation12 + $0x128] sm:$0xff]  }
 0x243   : > { %v2982_v17 = vpop.f32.mrf.mxu0  ;;  %v3004_v0 = vpop.f32.mrf.mxu1 }
 0x244   : > { %v1552_v19 = vadd.f32 %v3002_v15, %v1511_v14  ;;  %v2983_v20 = vadd.f32 %v2982_v17, %v2981_v8  ;;  %v3005_v23 = vadd.f32 %v3004_v0, %v3003_v9  ;;  %v3317_v14 = vld [vmem:[#allocation12 + $0x1e0] sm:$0xff]   ;;  %v3320_v17 = vld [vmem:[#allocation12 + $0x158] sm:$0xff]  }
 0x245   : > { %v1737_v21 = vpop.f32.mrf.mxu0  ;;  %v1778_v22 = vpop.f32.mrf.mxu1  ;;  %v3318_v15 = vld [vmem:[#allocation12 + $0x120] sm:$0xff]   ;;  %v3321_v0 = vld [vmem:[#allocation12 + $0x1d8] sm:$0xff]  }
 0x246   : > { %1558 = vst [vmem:[%s475_s13] sm:$0xff] %v1552_v19  ;;  %v1514_v46 = vadd.f32 %v2983_v20, %v1473_v18  ;;  %v1738_v24 = vadd.f32 %v1737_v21, %v1583_v10  ;;  %v1779_v25 = vadd.f32 %v1778_v22, %v1591_v16  ;;  %v3315_v10 = vld [vmem:[#allocation12 + $0x1a8] sm:$0xff]   ;;  %v3319_v16 = vld [vmem:[#allocation12 + $0x1a0] sm:$0xff]   ;;  %v3322_v18 = vld [vmem:[#allocation12 + $0x118] sm:$0xff]   ;;  %v1607_v21 = vrot.slane %v3884_v1, %v582_v3 }
 0x247   : > { %v1739_v11 = vpop.f32.mrf.mxu0  ;;  %v1780_v26 = vpop.f32.mrf.mxu1  ;;  %v3323_v19 = vld [vmem:[#allocation12 + $0x198] sm:$0xff]   ;;  %v3324_v20 = vld [vmem:[#allocation12 + $0x150] sm:$0xff]   ;;  %v3332_v3 = vld [vmem:[#allocation12 + $0x140] sm:$0xff]  }
 0x248   : > { %v1555_v27 = vadd.f32 %v3005_v23, %v1514_v46  ;;  %v1869_v28 = vmax.f32 %v1779_v25, 0.0  ;;  %v1740_v29 = vadd.f32 %v1739_v11, %v1587_v45  ;;  %v1867_v30 = vmax.f32 %v1738_v24, 0.0  ;;  %v3325_v45 = vld [vmem:[#allocation12 + $0x1d0] sm:$0xff]   ;;  %v3328_v23 = vld [vmem:[#allocation12 + $0x148] sm:$0xff]  }
 0x249   : > { %v1781_v34 = vadd.f32 %v1780_v26, %v1595_v47  ;;  %v1741_v12 = vpop.f32.mrf.mxu0  ;;  %v1782_v31 = vpop.f32.mrf.mxu1  ;;  %v3326_v22 = vld [vmem:[#allocation12 + $0x110] sm:$0xff]   ;;  %v1599_v47 = vrot.slane %v3884_v1, %v574_v63  ;;  %v3329_v24 = vld [vmem:[#allocation12 + $0x1c8] sm:$0xff]   ;;  %v3334_v63 = vld [vmem:[#allocation12 + $0x100] sm:$0xff]  }
 0x24a   : > { %1559 = vst [vmem:[%s475_s13 + $0x8] sm:$0xff] %v1555_v27  ;;  %v1868_v32 = vmax.f32 %v1740_v29, 0.0  ;;  %v1877_v35 = vpack.c.bf16 %v1869_v28, %v1869_v28  ;;  %v1875_v42 = vpack.c.bf16 %v1867_v30, %v1867_v30  ;;  %v3327_v46 = vld [vmem:[#allocation12 + $0x190] sm:$0xff]   ;;  %v3330_v11 = vld [vmem:[#allocation12 + $0x108] sm:$0xff]   ;;  %v3333_v28 = vld [vmem:[#allocation12 + $0x1c0] sm:$0xff]  }
 0x24b   : > { %v1870_v33 = vmax.f32 %v1781_v34, 0.0  ;;  %v1742_v36 = vpop.f32.mrf.mxu0  ;;  %v1783_v37 = vpop.f32.mrf.mxu1  ;;  %v3331_v27 = vld [vmem:[#allocation12 + $0x188] sm:$0xff]   ;;  %v3335_v29 = vld [vmem:[#allocation12 + $0x180] sm:$0xff]  }
 0x24c   : > { %v1876_v38 = vpack.c.bf16 %v1868_v32, %v1868_v32 }
 0x24d   : > { %v1878_v43 = vpack.c.bf16 %v1870_v33, %v1870_v33  ;;  %v3908_v50 = vpop.f32.mrf.mxu0  ;;  %v1860_v51 = vpop.f32.mrf.mxu1 }
 0x24e   : > { %2434 = vmatprep.mubr.bf16.mxu0 %v1876_v38  ;;  %v1861_v25 = vadd.f32 %v1860_v51, %v1607_v21  ;;  %v1820_v26 = vadd.f32 %v3908_v50, %v1599_v47 }
 0x24f   : > { %2474 = vmatprep.mubr.bf16.mxu1 %v1878_v43  ;;  %2435 = vmatmul.mubr.bf16.vlgmr.msra.gmra.mxu0 %v1875_v42  ;;  %v1821_v53 = vpop.f32.mrf.mxu0  ;;  %v1862_v54 = vpop.f32.mrf.mxu1 }
 0x250   : > { %2475 = vmatmul.mubr.bf16.vlgmr.msra.gmra.mxu1 %v1877_v35  ;;  %3051 = vmatpush3.bf16.msra.mxu0 %v3306_v39  ;;  %v1822_v55 = vadd.f32 %v1821_v53, %v1603_v40  ;;  %v1863_v58 = vadd.f32 %v1862_v54, %v1611_v41  ;;  %v1873_v44 = vmax.f32 %v1861_v25, 0.0  ;;  %v1871_v1 = vmax.f32 %v1820_v26, 0.0  ;;  %v2849_v40 = vld [vmem:[%s3950_s8] ss:$0 sm:$0xff] }
 0x251   : > { %3073 = vmatpush3.bf16.msra.mxu1 %v3307_v48  ;;  %3052 = vmatprep.subr.bf16.mxu0 %v3308_v49  ;;  %v1823_v60 = vpop.f32.mrf.mxu0  ;;  %v1864_v61 = vpop.f32.mrf.mxu1 }
 0x252   : > { %3074 = vmatprep.subr.bf16.mxu1 %v3309_v52  ;;  %v1872_v2 = vmax.f32 %v1822_v55, 0.0  ;;  %v1874_v4 = vmax.f32 %v1863_v58, 0.0  ;;  %v1881_v30 = vpack.c.bf16 %v1873_v44, %v1873_v44  ;;  %v1879_v34 = vpack.c.bf16 %v1871_v1, %v1871_v1 }
 0x253   : > { %v1824_v5 = vpop.f32.mrf.mxu0  ;;  %v1865_v6 = vpop.f32.mrf.mxu1 }
 0x254   : > { %3053 = vmatpush3.bf16.msra.mxu0 %v3310_v56  ;;  %v1880_v8 = vpack.c.bf16 %v1872_v2, %v1872_v2  ;;  %v1882_v9 = vpack.c.bf16 %v1874_v4, %v1874_v4 }
 0x255   : > { %3075 = vmatpush3.bf16.msra.mxu1 %v3311_v57  ;;  %3054 = vmatprep.subr.bf16.mxu0 %v3312_v59 }
 0x256   : > { %3076 = vmatprep.subr.bf16.mxu1 %v3313_v62  ;;  %2514 = vmatprep.mubr.bf16.mxu0 %v1880_v8 }
 0x257   : > { %2554 = vmatprep.mubr.bf16.mxu1 %v1882_v9 }
 0x258   : > { %3055 = vmatpush3.bf16.msra.mxu0 %v3314_v7 }
 0x259   : > { %3077 = vmatpush3.bf16.msra.mxu1 %v3315_v10  ;;  %3056 = vmatprep.subr.bf16.mxu0 %v3316_v13 }
 0x25a   : > { %3078 = vmatprep.subr.bf16.mxu1 %v3317_v14 }
 0x25c   : > { %3057 = vmatpush3.bf16.msra.mxu0 %v3318_v15 }
 0x25d   : > { %3079 = vmatpush3.bf16.msra.mxu1 %v3319_v16  ;;  %3058 = vmatprep.subr.bf16.mxu0 %v3320_v17 }
 0x25e   : > { %3080 = vmatprep.subr.bf16.mxu1 %v3321_v0 }
 0x260   : > { %3059 = vmatpush3.bf16.msra.mxu0 %v3322_v18 }
 0x261   : > { %3081 = vmatpush3.bf16.msra.mxu1 %v3323_v19  ;;  %3060 = vmatprep.subr.bf16.mxu0 %v3324_v20 }
 0x262   : > { %3082 = vmatprep.subr.bf16.mxu1 %v3325_v45 }
 0x264   : > { %3061 = vmatpush3.bf16.msra.mxu0 %v3326_v22 }
 0x265   : > { %3083 = vmatpush3.bf16.msra.mxu1 %v3327_v46  ;;  %3062 = vmatprep.subr.bf16.mxu0 %v3328_v23 }
 0x266   : > { %3084 = vmatprep.subr.bf16.mxu1 %v3329_v24 }
 0x268   : > { %3063 = vmatpush3.bf16.msra.mxu0 %v3330_v11 }
 0x269   : > { %3085 = vmatpush3.bf16.msra.mxu1 %v3331_v27  ;;  %3064 = vmatprep.subr.bf16.mxu0 %v3332_v3 }
 0x26a   : > { %3086 = vmatprep.subr.bf16.mxu1 %v3333_v28 }
 0x26c   : > { %3065 = vmatpush3.bf16.msra.mxu0 %v3334_v63 }
 0x26d   : > { %3087 = vmatpush3.bf16.msra.mxu1 %v3335_v29 }
 0x26f   : > { %2515 = vmatmul.mubr.bf16.vlgmr.msra.gmra.mxu0 %v1879_v34 }
 0x270   : > { %2555 = vmatmul.mubr.bf16.vlgmr.msra.gmra.mxu1 %v1881_v30 }
 0x30f   : > { %v3022_v12 = vpop.f32.mrf.mxu0 }
 0x310   : > { %v3044_v31 = vpop.f32.mrf.mxu1 }
 0x311   : > { %v3023_v32 = vpop.f32.mrf.mxu0 }
 0x312   : > { %v3045_v33 = vpop.f32.mrf.mxu1  ;;  %v3024_v39 = vadd.f32 %v3023_v32, %v3022_v12 }
 0x313   : > { %v3025_v36 = vpop.f32.mrf.mxu0  ;;  %v3046_v43 = vadd.f32 %v3045_v33, %v3044_v31 }
 0x314   : > { %v3047_v37 = vpop.f32.mrf.mxu1  ;;  %v2437_v41 = vadd.f32 %v3024_v39, %v2849_v40 }
 0x315   : > { %v3026_v35 = vpop.f32.mrf.mxu0 }
 0x316   : > { %v3048_v38 = vpop.f32.mrf.mxu1  ;;  %v2477_v50 = vadd.f32 %v3046_v43, %v2437_v41 }
 0x32f   : > { %v3066_v42 = vpop.f32.mrf.mxu0 }
 0x330   : > { %v3088_v48 = vpop.f32.mrf.mxu1 }
 0x331   : > { %v3067_v49 = vpop.f32.mrf.mxu0 }
 0x332   : > { %v3068_v51 = vadd.f32 %v3067_v49, %v3066_v42  ;;  %v3089_v52 = vpop.f32.mrf.mxu1 }
 0x333   : > { %v3069_v53 = vpop.f32.mrf.mxu0  ;;  %v3090_v56 = vadd.f32 %v3089_v52, %v3088_v48 }
 0x334   : > { %v2517_v54 = vadd.f32 %v3068_v51, %v2477_v50  ;;  %v3091_v55 = vpop.f32.mrf.mxu1 }
 0x335   : > { %v3070_v58 = vpop.f32.mrf.mxu0 }
 0x336   : > { %v2557_v57 = vadd.f32 %v3090_v56, %v2517_v54  ;;  %v3092_v59 = vpop.f32.mrf.mxu1 }
 0x338   : > { %2562 = vst [vmem:[%s479_s19] sm:$0x3] %v2557_v57 }
 0x339 PF: > { %s27_s18 = sadd.s32 1, %s3556_s18   ;;  %s3980_s13 = smov %s3540_s14 }
 0x33a   : > { %p24_p0 = scmp.ge.s32.totalorder %s27_s18, 4   ;;  %s3981_s14 = smov %s3544_s15 }
 0x33b   : > { %s3982_s15 = smov %s3754_s28  ;;  %s3983_s16 = smov %s3552_s17 }
 0x33c   : > { %s3984_s17 = smov %s3986_s24  ;;  %26 = sbr.rel (!%p24_p0) target bundleno = 12 (0xc), region = 137 }
 0x341   :  { %2598 = vsyncpa [#allocation5], 1 }
 0x342   :  { %2600 = vsyncpa [#allocation5 + $0x1], 1 }
 0x343   :  { %2601 = vsyncpa [#allocation7], 1 }
 0x344   :  { %2602 = vsyncpa [#allocation10], 1 }
 0x345   :  { %2603 = vsyncpa [#allocation13], 1 }

</bundles_post_ra>
